<compile_context>
chip_gen: v6e
topology: v6e:2x2x1
jax: 0.10.0
libtpu: 0.0.40
codegen_flags: <defaults>
</compile_context>

<pallas_src>
import functools
import math

import jax
import jax.numpy as jnp
from jax.experimental import pallas as pl
from jax.experimental.pallas import tpu as pltpu


_STACKED_ORDER = ("wqkv", "bqkv", "wo", "bo", "w1", "b1", "w2", "b2",
                  "g1", "be1", "g2", "be2")
_BF16_WEIGHTS = ("wqkv", "wo", "w1", "w2")     # big matrices stored bf16 in HBM


# ----------------------------- fused Pallas kernel ------------------------------


def fused_encoder_kernel(
    x_ref,
    wqkv_ref, bqkv_ref, wo_ref, bo_ref,
    w1_ref, b1_ref, w2_ref, b2_ref,
    g1_ref, be1_ref, g2_ref, be2_ref,
    o_ref,
    acc_ref,
    *, num_heads,
):
    f32 = jnp.float32
    bf16 = jnp.bfloat16
    eps = 1e-5                                   # PyTorch nn.LayerNorm default
    layer = pl.program_id(1)
    num_layers = pl.num_programs(1)

    # Layer 0: initialize the f32 resident activation from the (PE-added) input.
    @pl.when(layer == 0)
    def _():
        acc_ref[...] = x_ref[...].astype(f32)

    xb = acc_ref[...]                            # (Bblk, S, D) f32, VMEM-resident
    Bblk, S, D = xb.shape
    H = num_heads
    dh = D // H
    inv_sqrt_dh = 1.0 / math.sqrt(dh)
    M = Bblk * S

    # Hoist weight / bias reads (each ref read exactly once per layer).
    wqkv = wqkv_ref[0]                           # (D, 3D)  bf16
    bqkv = bqkv_ref[0]                           # (1, 3D)  f32
    wo, bo = wo_ref[0], bo_ref[0]                # bf16 / f32
    w1, b1 = w1_ref[0], b1_ref[0]
    w2, b2 = w2_ref[0], b2_ref[0]
    g1, be1 = g1_ref[0], be1_ref[0]
    g2, be2 = g2_ref[0], be2_ref[0]

    # Flatten batch-block into the matmul M dim (sublane-only reshape).
    x2d = xb.reshape(M, D)

    # ---- fused Q/K/V projection: bf16 MXU operands, f32 accumulation ----
    qkv = jnp.dot(x2d.astype(bf16), wqkv, preferred_element_type=f32) + bqkv   # (M, 3D)
    qkv3 = qkv.reshape(Bblk, S, 3 * D)

    # ---- self-attention: per-head contiguous lane slices (no (S,H,dh) relayout) ----
    # TODO(synk): for dh >= 128 a single head-batched contraction is preferable.
    ctx_heads = []
    for h in range(H):                           # H is small & static -> unrolled
        q_h = qkv3[:, :, 0 * D + h * dh: 0 * D + (h + 1) * dh]   # (Bblk, S, dh)
        k_h = qkv3[:, :, 1 * D + h * dh: 1 * D + (h + 1) * dh]
        v_h = qkv3[:, :, 2 * D + h * dh: 2 * D + (h + 1) * dh]
        s_h = jnp.einsum('bqd,bkd->bqk', q_h.astype(bf16), k_h.astype(bf16),
                         preferred_element_type=f32) * inv_sqrt_dh
        s_h = s_h - jnp.max(s_h, axis=-1, keepdims=True)
        p_h = jnp.exp(s_h)                                        # f32 EUP
        p_h = p_h * pl.reciprocal(jnp.sum(p_h, axis=-1, keepdims=True), approx=True)
        ctx_h = jnp.einsum('bqk,bkd->bqd', p_h.astype(bf16), v_h.astype(bf16),
                           preferred_element_type=f32)            # (Bblk, S, dh)
        ctx_heads.append(ctx_h)
    ctx = jnp.concatenate(ctx_heads, axis=-1).reshape(M, D)       # (M, D)

    attn = jnp.dot(ctx.astype(bf16), wo, preferred_element_type=f32) + bo

    # ---- residual + LayerNorm 1 (post-norm, f32) ----
    h1 = x2d + attn
    mu = jnp.mean(h1, axis=-1, keepdims=True)
    var = jnp.mean((h1 - mu) ** 2, axis=-1, keepdims=True)
    h1 = (h1 - mu) * jax.lax.rsqrt(var + eps) * g1 + be1

    # ---- feed-forward (Linear -> ReLU -> Linear), bf16 MXU operands ----
    ff = jnp.dot(h1.astype(bf16), w1, preferred_element_type=f32) + b1
    ff = jnp.maximum(ff, 0.0)
    ff = jnp.dot(ff.astype(bf16), w2, preferred_element_type=f32) + b2

    # ---- residual + LayerNorm 2 ----
    h2 = h1 + ff
    mu2 = jnp.mean(h2, axis=-1, keepdims=True)
    var2 = jnp.mean((h2 - mu2) ** 2, axis=-1, keepdims=True)
    out = (h2 - mu2) * jax.lax.rsqrt(var2 + eps) * g2 + be2

    acc_ref[...] = out.reshape(Bblk, S, D)       # stays f32 across layers

    # Only the last layer writes the output block back to HBM.
    @pl.when(layer == num_layers - 1)
    def _():
        o_ref[...] = out.reshape(Bblk, S, D).astype(o_ref.dtype)


# ------------------------------- wrapper -----------------------------------


def encoder_forward(x, pe, stacked, num_heads, *, batch_block=2):
    """x: (B, S, D); pe: (S, D); stacked[name]: (L, ...) per-layer parameters."""
    B, S, D = x.shape
    L = stacked["wqkv"].shape[0]
    if B % batch_block != 0:
        batch_block = 1

    # Fold the positional-encoding add into the wrapper (cheap XLA op).
    x = (x + pe[None, :S, :]).astype(x.dtype)

    args = [stacked[name] for name in _STACKED_ORDER]

    def wmap(b, l):                              # weight blocks indexed by layer
        return (l, 0, 0)

    # TODO(synk): if profiling on v6e shows exposed weight DMA, raise pipeline
    # depth on the FFN weight specs with pipeline_mode=pl.Buffered(3).
    weight_specs = [pl.BlockSpec((1,) + a.shape[1:], wmap) for a in args]
    kernel = functools.partial(fused_encoder_kernel, num_heads=num_heads)

    return pl.pallas_call(
        kernel,
        out_shape=jax.ShapeDtypeStruct((B, S, D), x.dtype),
        grid_spec=pltpu.PrefetchScalarGridSpec(
            num_scalar_prefetch=0,
            grid=(B // batch_block, L),          # layers innermost -> sequential
            in_specs=[pl.BlockSpec((batch_block, S, D), lambda b, l: (b, 0, 0))]
                     + weight_specs,
            out_specs=pl.BlockSpec((batch_block, S, D), lambda b, l: (b, 0, 0)),
            scratch_shapes=[pltpu.VMEM((batch_block, S, D), jnp.float32)],
        ),
        compiler_params=pltpu.CompilerParams(
            dimension_semantics=("parallel", "arbitrary"),
            vmem_limit_bytes=64 * 1024 * 1024),
    )(x, *args)


# ------------------------- deterministic parameters -------------------------


def make_positional_encoding(max_seq_length, d_model):
    pos = jnp.arange(max_seq_length, dtype=jnp.float32)[:, None]          # (L, 1)
    i = jnp.arange(0, d_model, 2, dtype=jnp.float32)[None, :]             # (1, D/2)
    angle = pos / jnp.power(10000.0, i / d_model)
    pe = jnp.zeros((max_seq_length, d_model), jnp.float32)
    pe = pe.at[:, 0::2].set(jnp.sin(angle))
    pe = pe.at[:, 1::2].set(jnp.cos(angle))
    return pe


def make_layer_params(key, d_model, d_ff):
    ks = jax.random.split(key, 12)
    s = 0.02
    f32 = jnp.float32
    wq = s * jax.random.normal(ks[0], (d_model, d_model), f32)
    wk = s * jax.random.normal(ks[1], (d_model, d_model), f32)
    wv = s * jax.random.normal(ks[2], (d_model, d_model), f32)
    return {
        "wqkv": jnp.concatenate([wq, wk, wv], axis=1),       # fused (D, 3D)
        "bqkv": s * jax.random.normal(ks[3], (1, 3 * d_model), f32),
        "wo": s * jax.random.normal(ks[4], (d_model, d_model), f32),
        "bo": s * jax.random.normal(ks[5], (1, d_model), f32),
        "w1": s * jax.random.normal(ks[6], (d_model, d_ff), f32),
        "b1": s * jax.random.normal(ks[7], (1, d_ff), f32),
        "w2": s * jax.random.normal(ks[8], (d_ff, d_model), f32),
        "b2": s * jax.random.normal(ks[9], (1, d_model), f32),
        "g1": 1.0 + s * jax.random.normal(ks[10], (1, d_model), f32),
        "be1": jnp.zeros((1, d_model), f32),
        "g2": 1.0 + s * jax.random.normal(ks[11], (1, d_model), f32),
        "be2": jnp.zeros((1, d_model), f32),
    }


def stack_layer_params(layer_params):
    out = {}
    for name in _STACKED_ORDER:
        p = jnp.stack([lp[name] for lp in layer_params], axis=0)
        if name in _BF16_WEIGHTS:                # big matrices live in HBM as bf16
            p = p.astype(jnp.bfloat16)
        out[name] = p
    return out


# --------------------------- pure-JAX reference ------------------------------


def _layer_norm(x, g, b, eps=1e-5):
    mu = jnp.mean(x, axis=-1, keepdims=True)
    var = jnp.mean((x - mu) ** 2, axis=-1, keepdims=True)
    return (x - mu) * jax.lax.rsqrt(var + eps) * g + b


def encoder_reference(x, pe, stacked, num_heads):
    """f32 reference using the same stored (bf16-rounded) weight values."""
    B, S, D = x.shape
    H = num_heads
    dh = D // H
    f32 = jnp.float32
    x = x + pe[None, :S, :]
    L = stacked["wqkv"].shape[0]
    for l in range(L):
        wqkv = stacked["wqkv"][l].astype(f32)
        wo = stacked["wo"][l].astype(f32)
        w1 = stacked["w1"][l].astype(f32)
        w2 = stacked["w2"][l].astype(f32)
        qkv = x @ wqkv + stacked["bqkv"][l]                           # (B, S, 3D)
        q, k, v = jnp.split(qkv, 3, axis=-1)
        q = q.reshape(B, S, H, dh).transpose(0, 2, 1, 3)
        k = k.reshape(B, S, H, dh).transpose(0, 2, 1, 3)
        v = v.reshape(B, S, H, dh).transpose(0, 2, 1, 3)
        s = (q @ k.transpose(0, 1, 3, 2)) / math.sqrt(dh)
        p = jax.nn.softmax(s, axis=-1)
        ctx = (p @ v).transpose(0, 2, 1, 3).reshape(B, S, D)
        attn = ctx @ wo + stacked["bo"][l]
        h1 = _layer_norm(x + attn, stacked["g1"][l], stacked["be1"][l])
        ff = jnp.maximum(h1 @ w1 + stacked["b1"][l], 0.0)
        ff = ff @ w2 + stacked["b2"][l]
        x = _layer_norm(h1 + ff, stacked["g2"][l], stacked["be2"][l])
    return x


# ----------------------------------- main ------------------------------------


if __name__ == "__main__":
    # Module hyperparameters (small but lane-aligned: D, d_ff, 3D multiples of 128).
    num_layers = 2
    d_model = 128
    num_heads = 4
    d_ff = 256
    vocab_size = 100        # TokenEmbedding is constructed but unused in forward
    max_seq_length = 32
    drop_prob = 0.1         # identity at inference

    batch, seq = 4, 16
    batch_block = 2         # >=2 grid blocks on the parallel axis for v7x's 2 TCs

    root = jax.random.PRNGKey(0)
    k_x, *k_layers = jax.random.split(root, 1 + num_layers)

    # `source` is already an embedded float tensor in Encoder.forward.
    x = jax.random.normal(k_x, (batch, seq, d_model), jnp.float32)

    pe = make_positional_encoding(max_seq_length, d_model)[:seq]     # (S, D)

    layer_params = [make_layer_params(k, d_model, d_ff) for k in k_layers]
    stacked = stack_layer_params(layer_params)

    out = encoder_forward(x, pe, stacked, num_heads, batch_block=batch_block)
    out = jax.block_until_ready(out)

    assert out.shape == (batch, seq, d_model), out.shape
    assert bool(jnp.all(jnp.isfinite(out)))

    # bf16 MXU operands + approx reciprocal vs f32 reference -> loosen tolerance.
    ref = encoder_reference(x, pe, stacked, num_heads)
    max_err = float(jnp.max(jnp.abs(out - ref)))
    assert jnp.allclose(out, ref, atol=2e-2, rtol=2e-2), max_err

    print("KERNEL_OK")
</pallas_src>

<mosaic_0001>
module attributes {stable_mosaic.version = 11 : i64} {
  func.func @fused_encoder_kernel(%arg0: i32, %arg1: i32, %arg2: memref<2x16x128xf32, #tpu.memory_space<vmem>>, %arg3: memref<1x128x384xbf16, #tpu.memory_space<vmem>>, %arg4: memref<1x1x384xf32, #tpu.memory_space<vmem>>, %arg5: memref<1x128x128xbf16, #tpu.memory_space<vmem>>, %arg6: memref<1x1x128xf32, #tpu.memory_space<vmem>>, %arg7: memref<1x128x256xbf16, #tpu.memory_space<vmem>>, %arg8: memref<1x1x256xf32, #tpu.memory_space<vmem>>, %arg9: memref<1x256x128xbf16, #tpu.memory_space<vmem>>, %arg10: memref<1x1x128xf32, #tpu.memory_space<vmem>>, %arg11: memref<1x1x128xf32, #tpu.memory_space<vmem>>, %arg12: memref<1x1x128xf32, #tpu.memory_space<vmem>>, %arg13: memref<1x1x128xf32, #tpu.memory_space<vmem>>, %arg14: memref<1x1x128xf32, #tpu.memory_space<vmem>>, %arg15: memref<2x16x128xf32, #tpu.memory_space<vmem>>, %arg16: memref<2x16x128xf32, #tpu.memory_space<vmem>>) attributes {dimension_semantics = [#tpu.dimension_semantics<parallel>, #tpu.dimension_semantics<arbitrary>], iteration_bounds = array<i64: 2, 2>, scalar_prefetch = 0 : i64, scratch_operands = 1 : i64, tpu.core_type = #tpu.core_type<tc>, window_params = [{transform_indices = @transform_0, window_bounds = array<i64: 2, 16, 128>}, {transform_indices = @transform_1, window_bounds = array<i64: 1, 128, 384>}, {transform_indices = @transform_2, window_bounds = array<i64: 1, 1, 384>}, {transform_indices = @transform_3, window_bounds = array<i64: 1, 128, 128>}, {transform_indices = @transform_4, window_bounds = array<i64: 1, 1, 128>}, {transform_indices = @transform_5, window_bounds = array<i64: 1, 128, 256>}, {transform_indices = @transform_6, window_bounds = array<i64: 1, 1, 256>}, {transform_indices = @transform_7, window_bounds = array<i64: 1, 256, 128>}, {transform_indices = @transform_8, window_bounds = array<i64: 1, 1, 128>}, {transform_indices = @transform_9, window_bounds = array<i64: 1, 1, 128>}, {transform_indices = @transform_10, window_bounds = array<i64: 1, 1, 128>}, {transform_indices = @transform_11, window_bounds = array<i64: 1, 1, 128>}, {transform_indices = @transform_12, window_bounds = array<i64: 1, 1, 128>}, {transform_indices = @transform_13, window_bounds = array<i64: 2, 16, 128>}]} {
    %c0_i32 = arith.constant 0 : i32
    %0 = arith.cmpi eq, %arg1, %c0_i32 : i32
    %1 = arith.extui %0 : i1 to i32
    %c0_i32_0 = arith.constant 0 : i32
    %2 = arith.cmpi ne, %1, %c0_i32_0 : i32
    scf.if %2 {
      %c0_77 = arith.constant 0 : index
      %c0_78 = arith.constant 0 : index
      %c0_79 = arith.constant 0 : index
      %185 = vector.load %arg2[%c0_77, %c0_78, %c0_79] : memref<2x16x128xf32, #tpu.memory_space<vmem>>, vector<2x16x128xf32>
      %c0_80 = arith.constant 0 : index
      %c0_81 = arith.constant 0 : index
      %c0_82 = arith.constant 0 : index
      %186 = vector.load %arg16[%c0_80, %c0_81, %c0_82] : memref<2x16x128xf32, #tpu.memory_space<vmem>>, vector<2x16x128xf32>
      tpu.vector_store %arg16[%c0_80, %c0_81, %c0_82], %185 {strides = array<i32>} : memref<2x16x128xf32, #tpu.memory_space<vmem>>, vector<2x16x128xf32>,
    } else {
    }
    %c0 = arith.constant 0 : index
    %c0_1 = arith.constant 0 : index
    %c0_2 = arith.constant 0 : index
    %3 = vector.load %arg16[%c0, %c0_1, %c0_2] : memref<2x16x128xf32, #tpu.memory_space<vmem>>, vector<2x16x128xf32>
    %c0_3 = arith.constant 0 : index
    %c0_4 = arith.constant 0 : index
    %c0_5 = arith.constant 0 : index
    %4 = vector.load %arg3[%c0_3, %c0_4, %c0_5] : memref<1x128x384xbf16, #tpu.memory_space<vmem>>, vector<1x128x384xbf16>
    %5 = vector.shape_cast %4 : vector<1x128x384xbf16> to vector<128x384xbf16>
    %c0_6 = arith.constant 0 : index
    %c0_7 = arith.constant 0 : index
    %c0_8 = arith.constant 0 : index
    %6 = vector.load %arg4[%c0_6, %c0_7, %c0_8] : memref<1x1x384xf32, #tpu.memory_space<vmem>>, vector<1x1x384xf32>
    %7 = vector.shape_cast %6 : vector<1x1x384xf32> to vector<1x384xf32>
    %c0_9 = arith.constant 0 : index
    %c0_10 = arith.constant 0 : index
    %c0_11 = arith.constant 0 : index
    %8 = vector.load %arg5[%c0_9, %c0_10, %c0_11] : memref<1x128x128xbf16, #tpu.memory_space<vmem>>, vector<1x128x128xbf16>
    %9 = vector.shape_cast %8 : vector<1x128x128xbf16> to vector<128x128xbf16>
    %c0_12 = arith.constant 0 : index
    %c0_13 = arith.constant 0 : index
    %c0_14 = arith.constant 0 : index
    %10 = vector.load %arg6[%c0_12, %c0_13, %c0_14] : memref<1x1x128xf32, #tpu.memory_space<vmem>>, vector<1x1x128xf32>
    %11 = vector.shape_cast %10 : vector<1x1x128xf32> to vector<1x128xf32>
    %c0_15 = arith.constant 0 : index
    %c0_16 = arith.constant 0 : index
    %c0_17 = arith.constant 0 : index
    %12 = vector.load %arg7[%c0_15, %c0_16, %c0_17] : memref<1x128x256xbf16, #tpu.memory_space<vmem>>, vector<1x128x256xbf16>
    %13 = vector.shape_cast %12 : vector<1x128x256xbf16> to vector<128x256xbf16>
    %c0_18 = arith.constant 0 : index
    %c0_19 = arith.constant 0 : index
    %c0_20 = arith.constant 0 : index
    %14 = vector.load %arg8[%c0_18, %c0_19, %c0_20] : memref<1x1x256xf32, #tpu.memory_space<vmem>>, vector<1x1x256xf32>
    %15 = vector.shape_cast %14 : vector<1x1x256xf32> to vector<1x256xf32>
    %c0_21 = arith.constant 0 : index
    %c0_22 = arith.constant 0 : index
    %c0_23 = arith.constant 0 : index
    %16 = vector.load %arg9[%c0_21, %c0_22, %c0_23] : memref<1x256x128xbf16, #tpu.memory_space<vmem>>, vector<1x256x128xbf16>
    %17 = vector.shape_cast %16 : vector<1x256x128xbf16> to vector<256x128xbf16>
    %c0_24 = arith.constant 0 : index
    %c0_25 = arith.constant 0 : index
    %c0_26 = arith.constant 0 : index
    %18 = vector.load %arg10[%c0_24, %c0_25, %c0_26] : memref<1x1x128xf32, #tpu.memory_space<vmem>>, vector<1x1x128xf32>
    %19 = vector.shape_cast %18 : vector<1x1x128xf32> to vector<1x128xf32>
    %c0_27 = arith.constant 0 : index
    %c0_28 = arith.constant 0 : index
    %c0_29 = arith.constant 0 : index
    %20 = vector.load %arg11[%c0_27, %c0_28, %c0_29] : memref<1x1x128xf32, #tpu.memory_space<vmem>>, vector<1x1x128xf32>
    %21 = vector.shape_cast %20 : vector<1x1x128xf32> to vector<1x128xf32>
    %c0_30 = arith.constant 0 : index
    %c0_31 = arith.constant 0 : index
    %c0_32 = arith.constant 0 : index
    %22 = vector.load %arg12[%c0_30, %c0_31, %c0_32] : memref<1x1x128xf32, #tpu.memory_space<vmem>>, vector<1x1x128xf32>
    %23 = vector.shape_cast %22 : vector<1x1x128xf32> to vector<1x128xf32>
    %c0_33 = arith.constant 0 : index
    %c0_34 = arith.constant 0 : index
    %c0_35 = arith.constant 0 : index
    %24 = vector.load %arg13[%c0_33, %c0_34, %c0_35] : memref<1x1x128xf32, #tpu.memory_space<vmem>>, vector<1x1x128xf32>
    %25 = vector.shape_cast %24 : vector<1x1x128xf32> to vector<1x128xf32>
    %c0_36 = arith.constant 0 : index
    %c0_37 = arith.constant 0 : index
    %c0_38 = arith.constant 0 : index
    %26 = vector.load %arg14[%c0_36, %c0_37, %c0_38] : memref<1x1x128xf32, #tpu.memory_space<vmem>>, vector<1x1x128xf32>
    %27 = vector.shape_cast %26 : vector<1x1x128xf32> to vector<1x128xf32>
    %28 = vector.shape_cast %3 : vector<2x16x128xf32> to vector<32x128xf32>
    %29 = arith.truncf %28 : vector<32x128xf32> to vector<32x128xbf16>
    %cst = arith.constant dense<0.000000e+00> : vector<32x384xf32>
    %30 = tpu.matmul %29, %5, %cst {dimension_numbers = #tpu.dot_dimension_numbers<[1], [0], [0], [1], [0, 0, 1, 1], [], []>} : vector<32x128xbf16>, vector<128x384xbf16>, vector<32x384xf32> -> vector<32x384xf32>
    %31 = vector.broadcast %7 : vector<1x384xf32> to vector<32x384xf32>
    %32 = arith.addf %30, %31 : vector<32x384xf32>
    %33 = vector.shape_cast %32 : vector<32x384xf32> to vector<2x16x384xf32>
    %34 = vector.extract_strided_slice %33 {offsets = [0, 0, 0], sizes = [2, 16, 32], strides = [1, 1, 1]} : vector<2x16x384xf32> to vector<2x16x32xf32>
    %35 = vector.extract_strided_slice %33 {offsets = [0, 0, 128], sizes = [2, 16, 32], strides = [1, 1, 1]} : vector<2x16x384xf32> to vector<2x16x32xf32>
    %36 = vector.extract_strided_slice %33 {offsets = [0, 0, 256], sizes = [2, 16, 32], strides = [1, 1, 1]} : vector<2x16x384xf32> to vector<2x16x32xf32>
    %37 = arith.truncf %34 : vector<2x16x32xf32> to vector<2x16x32xbf16>
    %38 = arith.truncf %35 : vector<2x16x32xf32> to vector<2x16x32xbf16>
    "tpu.trace_start"() <{level = 10 : i32, message = "bqd,bkd->bqk"}> : () -> ()
    %cst_39 = arith.constant dense<0.000000e+00> : vector<2x16x16xf32>
    %39 = tpu.matmul %37, %38, %cst_39 {dimension_numbers = #tpu.dot_dimension_numbers<[2], [2], [1], [1], [0, 0, 0, 1, 1, 1], [0], [0]>} : vector<2x16x32xbf16>, vector<2x16x32xbf16>, vector<2x16x16xf32> -> vector<2x16x16xf32>
    "tpu.trace_stop"() : () -> ()
    %cst_40 = arith.constant 0.176776692 : f32
    %40 = vector.broadcast %cst_40 : f32 to vector<2x16x16xf32>
    %41 = arith.mulf %39, %40 : vector<2x16x16xf32>
    %cst_41 = arith.constant dense<0xFF800000> : vector<2x16xf32>
    %42 = vector.multi_reduction <maximumf>, %41, %cst_41 [2] : vector<2x16x16xf32> to vector<2x16xf32>
    %43 = vector.shape_cast %42 : vector<2x16xf32> to vector<2x16x1xf32>
    %44 = vector.broadcast %43 : vector<2x16x1xf32> to vector<2x16x16xf32>
    %45 = arith.subf %41, %44 : vector<2x16x16xf32>
    %46 = math.exp %45 : vector<2x16x16xf32>
    %cst_42 = arith.constant dense<0.000000e+00> : vector<2x16xf32>
    %47 = vector.multi_reduction <add>, %46, %cst_42 [2] : vector<2x16x16xf32> to vector<2x16xf32>
    %48 = vector.shape_cast %47 : vector<2x16xf32> to vector<2x16x1xf32>
    %49 = tpu.reciprocal %48 {approx = true} : vector<2x16x1xf32> -> vector<2x16x1xf32>
    %50 = vector.broadcast %49 : vector<2x16x1xf32> to vector<2x16x16xf32>
    %51 = arith.mulf %46, %50 : vector<2x16x16xf32>
    %52 = arith.truncf %51 : vector<2x16x16xf32> to vector<2x16x16xbf16>
    %53 = arith.truncf %36 : vector<2x16x32xf32> to vector<2x16x32xbf16>
    "tpu.trace_start"() <{level = 10 : i32, message = "bqk,bkd->bqd"}> : () -> ()
    %cst_43 = arith.constant dense<0.000000e+00> : vector<2x16x32xf32>
    %54 = tpu.matmul %52, %53, %cst_43 {dimension_numbers = #tpu.dot_dimension_numbers<[2], [1], [1], [2], [0, 0, 0, 1, 1, 2], [0], [0]>} : vector<2x16x16xbf16>, vector<2x16x32xbf16>, vector<2x16x32xf32> -> vector<2x16x32xf32>
    "tpu.trace_stop"() : () -> ()
    %55 = vector.extract_strided_slice %33 {offsets = [0, 0, 32], sizes = [2, 16, 32], strides = [1, 1, 1]} : vector<2x16x384xf32> to vector<2x16x32xf32>
    %56 = vector.extract_strided_slice %33 {offsets = [0, 0, 160], sizes = [2, 16, 32], strides = [1, 1, 1]} : vector<2x16x384xf32> to vector<2x16x32xf32>
    %57 = vector.extract_strided_slice %33 {offsets = [0, 0, 288], sizes = [2, 16, 32], strides = [1, 1, 1]} : vector<2x16x384xf32> to vector<2x16x32xf32>
    %58 = arith.truncf %55 : vector<2x16x32xf32> to vector<2x16x32xbf16>
    %59 = arith.truncf %56 : vector<2x16x32xf32> to vector<2x16x32xbf16>
    "tpu.trace_start"() <{level = 10 : i32, message = "bqd,bkd->bqk"}> : () -> ()
    %cst_44 = arith.constant dense<0.000000e+00> : vector<2x16x16xf32>
    %60 = tpu.matmul %58, %59, %cst_44 {dimension_numbers = #tpu.dot_dimension_numbers<[2], [2], [1], [1], [0, 0, 0, 1, 1, 1], [0], [0]>} : vector<2x16x32xbf16>, vector<2x16x32xbf16>, vector<2x16x16xf32> -> vector<2x16x16xf32>
    "tpu.trace_stop"() : () -> ()
    %cst_45 = arith.constant 0.176776692 : f32
    %61 = vector.broadcast %cst_45 : f32 to vector<2x16x16xf32>
    %62 = arith.mulf %60, %61 : vector<2x16x16xf32>
    %cst_46 = arith.constant dense<0xFF800000> : vector<2x16xf32>
    %63 = vector.multi_reduction <maximumf>, %62, %cst_46 [2] : vector<2x16x16xf32> to vector<2x16xf32>
    %64 = vector.shape_cast %63 : vector<2x16xf32> to vector<2x16x1xf32>
    %65 = vector.broadcast %64 : vector<2x16x1xf32> to vector<2x16x16xf32>
    %66 = arith.subf %62, %65 : vector<2x16x16xf32>
    %67 = math.exp %66 : vector<2x16x16xf32>
    %cst_47 = arith.constant dense<0.000000e+00> : vector<2x16xf32>
    %68 = vector.multi_reduction <add>, %67, %cst_47 [2] : vector<2x16x16xf32> to vector<2x16xf32>
    %69 = vector.shape_cast %68 : vector<2x16xf32> to vector<2x16x1xf32>
    %70 = tpu.reciprocal %69 {approx = true} : vector<2x16x1xf32> -> vector<2x16x1xf32>
    %71 = vector.broadcast %70 : vector<2x16x1xf32> to vector<2x16x16xf32>
    %72 = arith.mulf %67, %71 : vector<2x16x16xf32>
    %73 = arith.truncf %72 : vector<2x16x16xf32> to vector<2x16x16xbf16>
    %74 = arith.truncf %57 : vector<2x16x32xf32> to vector<2x16x32xbf16>
    "tpu.trace_start"() <{level = 10 : i32, message = "bqk,bkd->bqd"}> : () -> ()
    %cst_48 = arith.constant dense<0.000000e+00> : vector<2x16x32xf32>
    %75 = tpu.matmul %73, %74, %cst_48 {dimension_numbers = #tpu.dot_dimension_numbers<[2], [1], [1], [2], [0, 0, 0, 1, 1, 2], [0], [0]>} : vector<2x16x16xbf16>, vector<2x16x32xbf16>, vector<2x16x32xf32> -> vector<2x16x32xf32>
    "tpu.trace_stop"() : () -> ()
    %76 = vector.extract_strided_slice %33 {offsets = [0, 0, 64], sizes = [2, 16, 32], strides = [1, 1, 1]} : vector<2x16x384xf32> to vector<2x16x32xf32>
    %77 = vector.extract_strided_slice %33 {offsets = [0, 0, 192], sizes = [2, 16, 32], strides = [1, 1, 1]} : vector<2x16x384xf32> to vector<2x16x32xf32>
    %78 = vector.extract_strided_slice %33 {offsets = [0, 0, 320], sizes = [2, 16, 32], strides = [1, 1, 1]} : vector<2x16x384xf32> to vector<2x16x32xf32>
    %79 = arith.truncf %76 : vector<2x16x32xf32> to vector<2x16x32xbf16>
    %80 = arith.truncf %77 : vector<2x16x32xf32> to vector<2x16x32xbf16>
    "tpu.trace_start"() <{level = 10 : i32, message = "bqd,bkd->bqk"}> : () -> ()
    %cst_49 = arith.constant dense<0.000000e+00> : vector<2x16x16xf32>
    %81 = tpu.matmul %79, %80, %cst_49 {dimension_numbers = #tpu.dot_dimension_numbers<[2], [2], [1], [1], [0, 0, 0, 1, 1, 1], [0], [0]>} : vector<2x16x32xbf16>, vector<2x16x32xbf16>, vector<2x16x16xf32> -> vector<2x16x16xf32>
    "tpu.trace_stop"() : () -> ()
    %cst_50 = arith.constant 0.176776692 : f32
    %82 = vector.broadcast %cst_50 : f32 to vector<2x16x16xf32>
    %83 = arith.mulf %81, %82 : vector<2x16x16xf32>
    %cst_51 = arith.constant dense<0xFF800000> : vector<2x16xf32>
    %84 = vector.multi_reduction <maximumf>, %83, %cst_51 [2] : vector<2x16x16xf32> to vector<2x16xf32>
    %85 = vector.shape_cast %84 : vector<2x16xf32> to vector<2x16x1xf32>
    %86 = vector.broadcast %85 : vector<2x16x1xf32> to vector<2x16x16xf32>
    %87 = arith.subf %83, %86 : vector<2x16x16xf32>
    %88 = math.exp %87 : vector<2x16x16xf32>
    %cst_52 = arith.constant dense<0.000000e+00> : vector<2x16xf32>
    %89 = vector.multi_reduction <add>, %88, %cst_52 [2] : vector<2x16x16xf32> to vector<2x16xf32>
    %90 = vector.shape_cast %89 : vector<2x16xf32> to vector<2x16x1xf32>
    %91 = tpu.reciprocal %90 {approx = true} : vector<2x16x1xf32> -> vector<2x16x1xf32>
    %92 = vector.broadcast %91 : vector<2x16x1xf32> to vector<2x16x16xf32>
    %93 = arith.mulf %88, %92 : vector<2x16x16xf32>
    %94 = arith.truncf %93 : vector<2x16x16xf32> to vector<2x16x16xbf16>
    %95 = arith.truncf %78 : vector<2x16x32xf32> to vector<2x16x32xbf16>
    "tpu.trace_start"() <{level = 10 : i32, message = "bqk,bkd->bqd"}> : () -> ()
    %cst_53 = arith.constant dense<0.000000e+00> : vector<2x16x32xf32>
    %96 = tpu.matmul %94, %95, %cst_53 {dimension_numbers = #tpu.dot_dimension_numbers<[2], [1], [1], [2], [0, 0, 0, 1, 1, 2], [0], [0]>} : vector<2x16x16xbf16>, vector<2x16x32xbf16>, vector<2x16x32xf32> -> vector<2x16x32xf32>
    "tpu.trace_stop"() : () -> ()
    %97 = vector.extract_strided_slice %33 {offsets = [0, 0, 96], sizes = [2, 16, 32], strides = [1, 1, 1]} : vector<2x16x384xf32> to vector<2x16x32xf32>
    %98 = vector.extract_strided_slice %33 {offsets = [0, 0, 224], sizes = [2, 16, 32], strides = [1, 1, 1]} : vector<2x16x384xf32> to vector<2x16x32xf32>
    %99 = vector.extract_strided_slice %33 {offsets = [0, 0, 352], sizes = [2, 16, 32], strides = [1, 1, 1]} : vector<2x16x384xf32> to vector<2x16x32xf32>
    %100 = arith.truncf %97 : vector<2x16x32xf32> to vector<2x16x32xbf16>
    %101 = arith.truncf %98 : vector<2x16x32xf32> to vector<2x16x32xbf16>
    "tpu.trace_start"() <{level = 10 : i32, message = "bqd,bkd->bqk"}> : () -> ()
    %cst_54 = arith.constant dense<0.000000e+00> : vector<2x16x16xf32>
    %102 = tpu.matmul %100, %101, %cst_54 {dimension_numbers = #tpu.dot_dimension_numbers<[2], [2], [1], [1], [0, 0, 0, 1, 1, 1], [0], [0]>} : vector<2x16x32xbf16>, vector<2x16x32xbf16>, vector<2x16x16xf32> -> vector<2x16x16xf32>
    "tpu.trace_stop"() : () -> ()
    %cst_55 = arith.constant 0.176776692 : f32
    %103 = vector.broadcast %cst_55 : f32 to vector<2x16x16xf32>
    %104 = arith.mulf %102, %103 : vector<2x16x16xf32>
    %cst_56 = arith.constant dense<0xFF800000> : vector<2x16xf32>
    %105 = vector.multi_reduction <maximumf>, %104, %cst_56 [2] : vector<2x16x16xf32> to vector<2x16xf32>
    %106 = vector.shape_cast %105 : vector<2x16xf32> to vector<2x16x1xf32>
    %107 = vector.broadcast %106 : vector<2x16x1xf32> to vector<2x16x16xf32>
    %108 = arith.subf %104, %107 : vector<2x16x16xf32>
    %109 = math.exp %108 : vector<2x16x16xf32>
    %cst_57 = arith.constant dense<0.000000e+00> : vector<2x16xf32>
    %110 = vector.multi_reduction <add>, %109, %cst_57 [2] : vector<2x16x16xf32> to vector<2x16xf32>
    %111 = vector.shape_cast %110 : vector<2x16xf32> to vector<2x16x1xf32>
    %112 = tpu.reciprocal %111 {approx = true} : vector<2x16x1xf32> -> vector<2x16x1xf32>
    %113 = vector.broadcast %112 : vector<2x16x1xf32> to vector<2x16x16xf32>
    %114 = arith.mulf %109, %113 : vector<2x16x16xf32>
    %115 = arith.truncf %114 : vector<2x16x16xf32> to vector<2x16x16xbf16>
    %116 = arith.truncf %99 : vector<2x16x32xf32> to vector<2x16x32xbf16>
    "tpu.trace_start"() <{level = 10 : i32, message = "bqk,bkd->bqd"}> : () -> ()
    %cst_58 = arith.constant dense<0.000000e+00> : vector<2x16x32xf32>
    %117 = tpu.matmul %115, %116, %cst_58 {dimension_numbers = #tpu.dot_dimension_numbers<[2], [1], [1], [2], [0, 0, 0, 1, 1, 2], [0], [0]>} : vector<2x16x16xbf16>, vector<2x16x32xbf16>, vector<2x16x32xf32> -> vector<2x16x32xf32>
    "tpu.trace_stop"() : () -> ()
    %118 = tpu.concatenate %54, %75, %96, %117 in 2 : vector<2x16x32xf32>, vector<2x16x32xf32>, vector<2x16x32xf32>, vector<2x16x32xf32> -> vector<2x16x128xf32>
    %119 = vector.shape_cast %118 : vector<2x16x128xf32> to vector<32x128xf32>
    %120 = arith.truncf %119 : vector<32x128xf32> to vector<32x128xbf16>
    %cst_59 = arith.constant dense<0.000000e+00> : vector<32x128xf32>
    %121 = tpu.matmul %120, %9, %cst_59 {dimension_numbers = #tpu.dot_dimension_numbers<[1], [0], [0], [1], [0, 0, 1, 1], [], []>} : vector<32x128xbf16>, vector<128x128xbf16>, vector<32x128xf32> -> vector<32x128xf32>
    %122 = vector.broadcast %11 : vector<1x128xf32> to vector<32x128xf32>
    %123 = arith.addf %121, %122 : vector<32x128xf32>
    %124 = arith.addf %28, %123 : vector<32x128xf32>
    %cst_60 = arith.constant dense<0.000000e+00> : vector<32xf32>
    %125 = vector.multi_reduction <add>, %124, %cst_60 [1] : vector<32x128xf32> to vector<32xf32>
    %126 = vector.shape_cast %125 : vector<32xf32> to vector<32x1xf32>
    %cst_61 = arith.constant 1.280000e+02 : f32
    %127 = vector.broadcast %cst_61 : f32 to vector<32x1xf32>
    %128 = arith.divf %126, %127 : vector<32x1xf32>
    %129 = vector.broadcast %128 : vector<32x1xf32> to vector<32x128xf32>
    %130 = arith.subf %124, %129 : vector<32x128xf32>
    %131 = arith.mulf %130, %130 : vector<32x128xf32>
    %cst_62 = arith.constant dense<0.000000e+00> : vector<32xf32>
    %132 = vector.multi_reduction <add>, %131, %cst_62 [1] : vector<32x128xf32> to vector<32xf32>
    %133 = vector.shape_cast %132 : vector<32xf32> to vector<32x1xf32>
    %cst_63 = arith.constant 1.280000e+02 : f32
    %134 = vector.broadcast %cst_63 : f32 to vector<32x1xf32>
    %135 = arith.divf %133, %134 : vector<32x1xf32>
    %136 = vector.broadcast %128 : vector<32x1xf32> to vector<32x128xf32>
    %137 = arith.subf %124, %136 : vector<32x128xf32>
    %cst_64 = arith.constant 9.99999974E-6 : f32
    %138 = vector.broadcast %cst_64 : f32 to vector<32x1xf32>
    %139 = arith.addf %135, %138 : vector<32x1xf32>
    %140 = math.rsqrt %139 : vector<32x1xf32>
    %141 = vector.broadcast %140 : vector<32x1xf32> to vector<32x128xf32>
    %142 = arith.mulf %137, %141 : vector<32x128xf32>
    %143 = vector.broadcast %21 : vector<1x128xf32> to vector<32x128xf32>
    %144 = arith.mulf %142, %143 : vector<32x128xf32>
    %145 = vector.broadcast %23 : vector<1x128xf32> to vector<32x128xf32>
    %146 = arith.addf %144, %145 : vector<32x128xf32>
    %147 = arith.truncf %146 : vector<32x128xf32> to vector<32x128xbf16>
    %cst_65 = arith.constant dense<0.000000e+00> : vector<32x256xf32>
    %148 = tpu.matmul %147, %13, %cst_65 {dimension_numbers = #tpu.dot_dimension_numbers<[1], [0], [0], [1], [0, 0, 1, 1], [], []>} : vector<32x128xbf16>, vector<128x256xbf16>, vector<32x256xf32> -> vector<32x256xf32>
    %149 = vector.broadcast %15 : vector<1x256xf32> to vector<32x256xf32>
    %150 = arith.addf %148, %149 : vector<32x256xf32>
    %cst_66 = arith.constant 0.000000e+00 : f32
    %151 = vector.broadcast %cst_66 : f32 to vector<32x256xf32>
    %152 = arith.maximumf %150, %151 : vector<32x256xf32>
    %153 = arith.truncf %152 : vector<32x256xf32> to vector<32x256xbf16>
    %cst_67 = arith.constant dense<0.000000e+00> : vector<32x128xf32>
    %154 = tpu.matmul %153, %17, %cst_67 {dimension_numbers = #tpu.dot_dimension_numbers<[1], [0], [0], [1], [0, 0, 1, 1], [], []>} : vector<32x256xbf16>, vector<256x128xbf16>, vector<32x128xf32> -> vector<32x128xf32>
    %155 = vector.broadcast %19 : vector<1x128xf32> to vector<32x128xf32>
    %156 = arith.addf %154, %155 : vector<32x128xf32>
    %157 = arith.addf %146, %156 : vector<32x128xf32>
    %cst_68 = arith.constant dense<0.000000e+00> : vector<32xf32>
    %158 = vector.multi_reduction <add>, %157, %cst_68 [1] : vector<32x128xf32> to vector<32xf32>
    %159 = vector.shape_cast %158 : vector<32xf32> to vector<32x1xf32>
    %cst_69 = arith.constant 1.280000e+02 : f32
    %160 = vector.broadcast %cst_69 : f32 to vector<32x1xf32>
    %161 = arith.divf %159, %160 : vector<32x1xf32>
    %162 = vector.broadcast %161 : vector<32x1xf32> to vector<32x128xf32>
    %163 = arith.subf %157, %162 : vector<32x128xf32>
    %164 = arith.mulf %163, %163 : vector<32x128xf32>
    %cst_70 = arith.constant dense<0.000000e+00> : vector<32xf32>
    %165 = vector.multi_reduction <add>, %164, %cst_70 [1] : vector<32x128xf32> to vector<32xf32>
    %166 = vector.shape_cast %165 : vector<32xf32> to vector<32x1xf32>
    %cst_71 = arith.constant 1.280000e+02 : f32
    %167 = vector.broadcast %cst_71 : f32 to vector<32x1xf32>
    %168 = arith.divf %166, %167 : vector<32x1xf32>
    %169 = vector.broadcast %161 : vector<32x1xf32> to vector<32x128xf32>
    %170 = arith.subf %157, %169 : vector<32x128xf32>
    %cst_72 = arith.constant 9.99999974E-6 : f32
    %171 = vector.broadcast %cst_72 : f32 to vector<32x1xf32>
    %172 = arith.addf %168, %171 : vector<32x1xf32>
    %173 = math.rsqrt %172 : vector<32x1xf32>
    %174 = vector.broadcast %173 : vector<32x1xf32> to vector<32x128xf32>
    %175 = arith.mulf %170, %174 : vector<32x128xf32>
    %176 = vector.broadcast %25 : vector<1x128xf32> to vector<32x128xf32>
    %177 = arith.mulf %175, %176 : vector<32x128xf32>
    %178 = vector.broadcast %27 : vector<1x128xf32> to vector<32x128xf32>
    %179 = arith.addf %177, %178 : vector<32x128xf32>
    %180 = vector.shape_cast %179 : vector<32x128xf32> to vector<2x16x128xf32>
    %c0_73 = arith.constant 0 : index
    %c0_74 = arith.constant 0 : index
    %c0_75 = arith.constant 0 : index
    %181 = vector.load %arg16[%c0_73, %c0_74, %c0_75] : memref<2x16x128xf32, #tpu.memory_space<vmem>>, vector<2x16x128xf32>
    tpu.vector_store %arg16[%c0_73, %c0_74, %c0_75], %180 {strides = array<i32>} : memref<2x16x128xf32, #tpu.memory_space<vmem>>, vector<2x16x128xf32>,
    %c1_i32 = arith.constant 1 : i32
    %182 = arith.cmpi eq, %arg1, %c1_i32 : i32
    %183 = arith.extui %182 : i1 to i32
    %c0_i32_76 = arith.constant 0 : i32
    %184 = arith.cmpi ne, %183, %c0_i32_76 : i32
    scf.if %184 {
      %185 = vector.shape_cast %179 : vector<32x128xf32> to vector<2x16x128xf32>
      %c0_77 = arith.constant 0 : index
      %c0_78 = arith.constant 0 : index
      %c0_79 = arith.constant 0 : index
      %186 = vector.load %arg15[%c0_77, %c0_78, %c0_79] : memref<2x16x128xf32, #tpu.memory_space<vmem>>, vector<2x16x128xf32>
      tpu.vector_store %arg15[%c0_77, %c0_78, %c0_79], %185 {strides = array<i32>} : memref<2x16x128xf32, #tpu.memory_space<vmem>>, vector<2x16x128xf32>,
    } else {
    }
    return
  }
  func.func @transform_0(%arg0: i32, %arg1: i32) -> (i32, i32, i32) {
    %c0_i32 = arith.constant 0 : i32
    %c0_i32_0 = arith.constant 0 : i32
    %c0_i32_1 = arith.constant 0 : i32
    return %arg0, %c0_i32, %c0_i32_0 : i32, i32, i32
  }
  func.func @transform_1(%arg0: i32, %arg1: i32) -> (i32, i32, i32) {
    %c0_i32 = arith.constant 0 : i32
    %c0_i32_0 = arith.constant 0 : i32
    %c0_i32_1 = arith.constant 0 : i32
    return %arg1, %c0_i32, %c0_i32_0 : i32, i32, i32
  }
  func.func @transform_2(%arg0: i32, %arg1: i32) -> (i32, i32, i32) {
    %c0_i32 = arith.constant 0 : i32
    %c0_i32_0 = arith.constant 0 : i32
    %c0_i32_1 = arith.constant 0 : i32
    return %arg1, %c0_i32, %c0_i32_0 : i32, i32, i32
  }
  func.func @transform_3(%arg0: i32, %arg1: i32) -> (i32, i32, i32) {
    %c0_i32 = arith.constant 0 : i32
    %c0_i32_0 = arith.constant 0 : i32
    %c0_i32_1 = arith.constant 0 : i32
    return %arg1, %c0_i32, %c0_i32_0 : i32, i32, i32
  }
  func.func @transform_4(%arg0: i32, %arg1: i32) -> (i32, i32, i32) {
    %c0_i32 = arith.constant 0 : i32
    %c0_i32_0 = arith.constant 0 : i32
    %c0_i32_1 = arith.constant 0 : i32
    return %arg1, %c0_i32, %c0_i32_0 : i32, i32, i32
  }
  func.func @transform_5(%arg0: i32, %arg1: i32) -> (i32, i32, i32) {
    %c0_i32 = arith.constant 0 : i32
    %c0_i32_0 = arith.constant 0 : i32
    %c0_i32_1 = arith.constant 0 : i32
    return %arg1, %c0_i32, %c0_i32_0 : i32, i32, i32
  }
  func.func @transform_6(%arg0: i32, %arg1: i32) -> (i32, i32, i32) {
    %c0_i32 = arith.constant 0 : i32
    %c0_i32_0 = arith.constant 0 : i32
    %c0_i32_1 = arith.constant 0 : i32
    return %arg1, %c0_i32, %c0_i32_0 : i32, i32, i32
  }
  func.func @transform_7(%arg0: i32, %arg1: i32) -> (i32, i32, i32) {
    %c0_i32 = arith.constant 0 : i32
    %c0_i32_0 = arith.constant 0 : i32
    %c0_i32_1 = arith.constant 0 : i32
    return %arg1, %c0_i32, %c0_i32_0 : i32, i32, i32
  }
  func.func @transform_8(%arg0: i32, %arg1: i32) -> (i32, i32, i32) {
    %c0_i32 = arith.constant 0 : i32
    %c0_i32_0 = arith.constant 0 : i32
    %c0_i32_1 = arith.constant 0 : i32
    return %arg1, %c0_i32, %c0_i32_0 : i32, i32, i32
  }
  func.func @transform_9(%arg0: i32, %arg1: i32) -> (i32, i32, i32) {
    %c0_i32 = arith.constant 0 : i32
    %c0_i32_0 = arith.constant 0 : i32
    %c0_i32_1 = arith.constant 0 : i32
    return %arg1, %c0_i32, %c0_i32_0 : i32, i32, i32
  }
  func.func @transform_10(%arg0: i32, %arg1: i32) -> (i32, i32, i32) {
    %c0_i32 = arith.constant 0 : i32
    %c0_i32_0 = arith.constant 0 : i32
    %c0_i32_1 = arith.constant 0 : i32
    return %arg1, %c0_i32, %c0_i32_0 : i32, i32, i32
  }
  func.func @transform_11(%arg0: i32, %arg1: i32) -> (i32, i32, i32) {
    %c0_i32 = arith.constant 0 : i32
    %c0_i32_0 = arith.constant 0 : i32
    %c0_i32_1 = arith.constant 0 : i32
    return %arg1, %c0_i32, %c0_i32_0 : i32, i32, i32
  }
  func.func @transform_12(%arg0: i32, %arg1: i32) -> (i32, i32, i32) {
    %c0_i32 = arith.constant 0 : i32
    %c0_i32_0 = arith.constant 0 : i32
    %c0_i32_1 = arith.constant 0 : i32
    return %arg1, %c0_i32, %c0_i32_0 : i32, i32, i32
  }
  func.func @transform_13(%arg0: i32, %arg1: i32) -> (i32, i32, i32) {
    %c0_i32 = arith.constant 0 : i32
    %c0_i32_0 = arith.constant 0 : i32
    %c0_i32_1 = arith.constant 0 : i32
    return %arg0, %c0_i32, %c0_i32_0 : i32, i32, i32
  }
}

</mosaic_0001>

<bundles_post_ra>
// kernel: tpu_custom_call.1
= control target key start
LH: loop header
LB: loop body
LE: loop exit
PB: predicated region body
PF: predicated region fallthrough
CT: control target
= control target key end

     0   :  { %s4858_s0 = inlined_call_operand.hbm [shape: f32[4,16,128], index: 0, kind: input, shape index: {}]   ;;  %s4859_s1 = inlined_call_operand.hbm [shape: bf16[2,128,384], index: 1, kind: input, shape index: {}]   ;;  %s4860_s2 = inlined_call_operand.hbm [shape: f32[2,1,384], index: 2, kind: input, shape index: {}]   ;;  %s4861_s3 = inlined_call_operand.hbm [shape: bf16[2,128,128], index: 3, kind: input, shape index: {}]   ;;  %s4862_s4 = inlined_call_operand.vmem [shape: f32[2,1,128], index: 4, kind: input, shape index: {}]   ;;  %s4863_s5 = inlined_call_operand.hbm [shape: bf16[2,128,256], index: 5, kind: input, shape index: {}]   ;;  %s4864_s6 = inlined_call_operand.vmem [shape: f32[2,1,256], index: 6, kind: input, shape index: {}]   ;;  %s4865_s7 = inlined_call_operand.hbm [shape: bf16[2,256,128], index: 7, kind: input, shape index: {}]   ;;  %s4866_s8 = inlined_call_operand.vmem [shape: f32[2,1,128], index: 8, kind: input, shape index: {}]   ;;  %s4867_s9 = inlined_call_operand.vmem [shape: f32[2,1,128], index: 9, kind: input, shape index: {}]   ;;  %s4868_s10 = inlined_call_operand.vmem [shape: f32[2,1,128], index: 10, kind: input, shape index: {}]   ;;  %s4869_s11 = inlined_call_operand.vmem [shape: f32[2,1,128], index: 11, kind: input, shape index: {}]   ;;  %s4870_s12 = inlined_call_operand.vmem [shape: f32[2,1,128], index: 12, kind: input, shape index: {}]   ;;  %s4871_s13 = inlined_call_operand.hbm [shape: f32[4,16,128], index: 13, kind: output, shape index: {}]  }
   0x1   :  { %4896 = sst [smem:[#allocation37_spill]] %s4858_s0 }
   0x2   :  { %4897 = sst [smem:[#allocation38_spill]] %s4859_s1 }
   0x3   :  { %4898 = sst [smem:[#allocation39_spill]] %s4860_s2 }
   0x4   :  { %4899 = sst [smem:[#allocation40_spill]] %s4861_s3 }
   0x5   :  { %4900 = sst [smem:[#allocation41_spill]] %s4862_s4 }
   0x6   :  { %4901 = sst [smem:[#allocation42_spill]] %s4863_s5 }
   0x7   :  { %4902 = sst [smem:[#allocation43_spill]] %s4864_s6 }
   0x8   :  { %4903 = sst [smem:[#allocation44_spill]] %s4865_s7 }
   0x9   :  { %4904 = sst [smem:[#allocation45_spill]] %s4866_s8 }
   0xa   :  { %4905 = sst [smem:[#allocation46_spill]] %s4867_s9 }
   0xb   :  { %4906 = sst [smem:[#allocation47_spill]] %s4868_s10 }
   0xc   :  { %4907 = sst [smem:[#allocation48_spill]] %s4869_s11 }
   0xd   :  { %4908 = sst [smem:[#allocation49_spill]] %s4870_s12 }
   0xe   :  { %4909 = sst [smem:[#allocation50_spill]] %s4871_s13 }
   0xf   :  { %18 = vsyncpa [#allocation4], 0 }
  0x10   :  { %20 = vsyncpa [#allocation4 + $0x1], 0 }
  0x11   :  { %21 = vsyncpa [#allocation7], 0 }
  0x12   :  { %23 = vsyncpa [#allocation7 + $0x1], 0 }
  0x13   :  { %24 = vsyncpa [#allocation10], 0 }
  0x14   :  { %26 = vsyncpa [#allocation10 + $0x1], 0 }
  0x15   :  { %27 = vsyncpa [#allocation13], 0 }
  0x16   :  { %29 = vsyncpa [#allocation13 + $0x1], 0 }
  0x17   :  { %30 = vsyncpa [#allocation5], 0 }
  0x18   :  { %32 = vsyncpa [#allocation5 + $0x1], 0  ;;  %s4096_s25 = smov 0   ;;  %s4098_s26 = smov 0  }
  0x19   :  { %s4100_s27 = smov 0   ;;  %s4102_s28 = smov 0  }
  0x1a   :  { %s4104_s29 = smov 0   ;;  %s4106_s30 = smov 0  }
  0x1b   :  { %s4108_s14 = smov 0   ;;  %s4110_s15 = smov 0  }
  0x1c   :  { %s4112_s16 = smov 0   ;;  %s4114_s17 = smov 0  }
  0x1d   :  { %s4116_s18 = smov 0  }
  0x1e LB: > { %4910 = sst [smem:[#allocation20_spill]] %s3967_s26  ;;  %p65_p0 = scmp.eq.s32.totalorder %s4003_s18, 0  ;;  %s4003_s18 = sphi %s4116_s18, %s38_s18   ;;  %s3999_s17 = sphi %s4114_s17, %s4984_s17   ;;  %s3995_s16 = sphi %s4112_s16, %s4983_s16   ;;  %s3991_s15 = sphi %s4110_s15, %s4982_s15   ;;  %s3987_s14 = sphi %s4108_s14, %s4981_s14   ;;  %s3983_s30 = sphi %s4106_s30, %s4980_s30   ;;  %s3979_s29 = sphi %s4104_s29, %s4979_s29   ;;  %s3975_s28 = sphi %s4102_s28, %s4978_s28   ;;  %s3971_s27 = sphi %s4100_s27, %s4977_s27   ;;  %s3967_s26 = sphi %s4098_s26, %s4976_s26   ;;  %s3963_s25 = sphi %s4096_s25, %s4975_s25  }
  0x1f   : > { %4911 = sst [smem:[#allocation21_spill]] %s3971_s27  ;;  %p90_p1 = scmp.ne.s32.totalorder %s3971_s27, %s3967_s26 }
  0x20   : > { %4912 = sst [smem:[#allocation22_spill]] %s3975_s28  ;;  %p96_p2 = scmp.ne.s32.totalorder %s3967_s26, %s3963_s25 }
  0x21   : > { %4913 = sst [smem:[#allocation23_spill]] %s3979_s29  ;;  %p4876_p3 = scmp.lt.s32.totalorder %s4003_s18, 4 }
  0x22   : > { %4914 = sst [smem:[#allocation24_spill]] %s3983_s30  ;;  %p92_p4 = por %p90_p1, %p65_p0 }
  0x23   : > { %4915 = sst [smem:[#allocation25_spill]] %s3987_s14  ;;  %s4873_s20 = sand.u32 1, %s4003_s18  }
  0x24   : > { %4916 = sst [smem:[#allocation26_spill]] %s3991_s15  ;;  %s4162_s21 = sand.u32 1, %s3971_s27  }
  0x25   : > { %4917 = sst [smem:[#allocation27_spill]] %s3995_s16  ;;  %s3362_s22 = smul.u32 192, %s4162_s21 }
  0x26   : > { %4918 = sst [smem:[#allocation28_spill]] %s3999_s17  ;;  %p4167_p5 = pnand %p4876_p3, %p92_p4 }
  0x27   : > { %4919 = sst [smem:[#allocation29_spill]] %s4003_s18  ;;  %s3363_s24 = smul.u32 3072, %s3995_s16 }
  0x28   : > { %s4921_s1 = sld [smem:[#allocation38_spill]]  ;;  %s458_s12 = scalar_lea.vmem [#allocation6], %s3362_s22 }
  0x29   : > { %s465_s11 = sshll.u32 %s458_s12, 4  ;;  %s4177_s10 = scalar_lea.sflag [#allocation7], %s4873_s20  ;;  %s466_s11 = int_to_ptr.vmem [resolvable:$true] %s465_s11 }
  0x2a   : > { %p4181_p6 = pneg %p4167_p5  ;;  %s3716_s8 = scalar_lea.vmem %s466_s11, 3072 }
  0x2b   : > { %p3717_p7 = scmp.ne.s32.totalorder %s466_s11, %s3716_s8  ;;  %s4005_s6 = smov [#allocation6]  }
  0x2c   : > { %s3721_s13 = sshll.u32 %s4005_s6, 4  ;;  %s3722_s13 = int_to_ptr.vmem [resolvable:$false] %s3721_s13 }
  0x2d   : > { %p3719_p8 = pnand %p3717_p7, %p4181_p6  ;;  %s3723_s15 = scalar_lea.vmem %s3722_s13, 6144 }
  0x2e   : > { %s464_s19 = scalar_lea.hbm %s4921_s1, %s3363_s24  ;;  %p3724_p10 = scmp.lt.s32.totalorder %s466_s11, %s3722_s13 }
  0x2f   : > { %p3720_p9 = pneg %p3719_p8  ;;  %p3725_p11 = scmp.lt.s32.totalorder %s3723_s15, %s3716_s8 }
  0x31   : > { %p3726_p12 = por %p3725_p11, %p3724_p10 }
  0x33   : > { %p3727_p13 = pnand %p3726_p12, %p3720_p9 }
  0x35   : > { %3730 = shalt.err (!%p3727_p13)
}
  0x36   : > { %s4006_s12 = smov 192   ;;  %s4007_s22 = smov 12  }
  0x37   : > { %3388 = dma.hbm_to_vmem [thread:$0]  (!%p4167_p5), %s464_s19, 3072, %s466_s11, %s4177_s10, %s4006_s12, %s4006_s12, %s4007_s22  }
  0x38   : > { %p3038_p1 = scmp.ge.s32.totalorder %s4003_s18, 1  ;;  %p598_p4 = scmp.lt.s32.totalorder %s4003_s18, 5 }
  0x39   : > { %s3029_s6 = sshll.u32 %s4162_s21, 6  ;;  %s3141_s24 = sshll.u32 %s3995_s16, 10 }
  0x3a   : > { %p4193_p7 = pnand %p3038_p1, %p598_p4  ;;  %s498_s13 = scalar_lea.vmem [#allocation9], %s3029_s6 }
  0x3b   : > { %s505_s15 = sshll.u32 %s498_s13, 4  ;;  %s4924_s3 = sld [smem:[#allocation40_spill]]  ;;  %s506_s15 = int_to_ptr.vmem [resolvable:$true] %s505_s15 }
  0x3c   : > { %s4925_s14 = sand.u32 1, %s4003_s18   ;;  %s3744_s5 = scalar_lea.vmem %s506_s15, 1024 }
  0x3d   : > { %s4203_s7 = scalar_lea.sflag [#allocation10], %s4925_s14  ;;  %p3745_p8 = scmp.ne.s32.totalorder %s506_s15, %s3744_s5 }
  0x3e   : > { %s4008_s11 = smov [#allocation9]  }
  0x3f   : > { %p3747_p9 = pnand %p3745_p8, %p4181_p6  ;;  %s3749_s19 = sshll.u32 %s4008_s11, 4  ;;  %s3750_s19 = int_to_ptr.vmem [resolvable:$false] %s3749_s19 }
  0x40   : > { %s3751_s12 = scalar_lea.vmem %s3750_s19, 2048  ;;  %p3752_p11 = scmp.lt.s32.totalorder %s506_s15, %s3750_s19 }
  0x41   : > { %s504_s4 = scalar_lea.hbm %s4924_s3, %s3141_s24  ;;  %p3748_p10 = pneg %p3747_p9 }
  0x42   : > { %p3753_p12 = scmp.lt.s32.totalorder %s3751_s12, %s3744_s5 }
  0x44   : > { %p3754_p13 = por %p3753_p12, %p3752_p11 }
  0x46   : > { %p3755_p1 = pnand %p3754_p13, %p3748_p10 }
  0x48   : > { %3758 = shalt.err (!%p3755_p1)
}
  0x49   : > { %s4875_s1 = smov 64   ;;  %s4878_s5 = smov 4  }
  0x4a   : > { %3394 = dma.hbm_to_vmem [thread:$0]  (!%p4167_p5), %s504_s4, 1024, %s506_s15, %s4203_s7, %s4875_s1, %s4875_s1, %s4878_s5  }
  0x4b   : > { %s4214_s14 = sadd.s32 4294967295, %s4003_s18   ;;  %s3020_s20 = sadd.s32 4294967294, %s4003_s18  }
  0x4c   : > { %s47_s22 = sadd.s32 1, %s3995_s16  ;;  %s50_s6 = sadd.s32 1, %s3999_s17 }
  0x4d   : > { %p48_p4 = scmp.ge.s32.totalorder %s47_s22, 2  ;;  %s57_s24 = sadd.s32 1, %s3983_s30 }
  0x4e   : > { %p64_p8 = scmp.ne.s32.totalorder %s3983_s30, %s3979_s29  ;;  %p4877_p9 = scmp.ne.s32.totalorder %s3979_s29, %s3975_s28 }
  0x4f   : > { %s4986_s22 = smov (%p48_p4, %s47_s22), 0  ;;  %s4988_s6 = smov (!%p48_p4, %s50_s6), %s3999_s17 }
  0x50   : > { %4926 = sst [smem:[#allocation30_spill]] %s4986_s22  ;;  %p4232_p10 = por %p65_p0, %p64_p8 }
  0x51   : > { %p71_p11 = scmp.eq.s32.totalorder %s4214_s14, 0  ;;  %p52_p12 = scmp.ge.s32.totalorder %s4988_s6, 2 }
  0x52   : > { %s80_s13 = ssub.s32 %s3995_s16, %s4986_s22  ;;  %s4930_s11 = sadd.s32 1, %s3971_s27 }
  0x53   : > { %p4242_p13 = por %p71_p11, %p4877_p9  ;;  %p81_p1 = scmp.eq.s32.totalorder %s80_s13, 0 }
  0x54   : > { %s4990_s6 = smov (%p52_p12, %s4988_s6), 0  ;;  %p4258_p0 = por %p96_p2, %p71_p11 }
  0x55   : > { %s4928_s15 = scalar_select %p4242_p13, 1, 0 }
  0x56   : > { %4929 = sst [smem:[#allocation31_spill]] %s4990_s6  ;;  %s54_s12 = ssub.s32 %s3999_s17, %s4990_s6 }
  0x57   : > { %s4251_s19 = scalar_select %p81_p1, %s3971_s27, %s4930_s11  }
  0x58   : > { %p55_p4 = scmp.eq.s32.totalorder %s54_s12, 0  ;;  %p406_p3 = scmp.eq.s32.totalorder %s4214_s14, 3 }
  0x59   : > { %4931 = sst [smem:[#allocation32_spill]] %s4251_s19  ;;  %p412_p9 = scmp.eq.s32.totalorder %s3020_s20, 3 }
  0x5a   : > { %s432_s5 = sand.u32 1, %s3983_s30   ;;  %p4270_p12 = por %p406_p3, %p64_p8 }
  0x5b   : > { %s4265_s13 = scalar_select %p55_p4, %s3983_s30, %s57_s24  }
  0x5c   : > { %s4934_s3 = scalar_select %p4270_p12, 1, 0 }
  0x5d   : > { %4933 = sst [smem:[#allocation33_spill]] %s4265_s13  ;;  %p4936_p1 = scmp.ne.s32.totalorder %s3979_s29, %s3975_s28 }
  0x5e   : > { %4935 = sst [smem:[#allocation34_spill]] %s4934_s3  ;;  %s3023_s25 = sshll.u32 %s432_s5, 5 }
  0x5f   : > { %p4277_p13 = por %p412_p9, %p4936_p1  ;;  %s3140_s6 = sshll.u32 %s3999_s17, 9 }
  0x60   : > { %s4939_s0 = sld [smem:[#allocation37_spill]]  ;;  %s436_s20 = scalar_lea.vmem [#allocation3], %s3023_s25 }
  0x61   : > { %s4937_s11 = scalar_select %p4277_p13, 1, 0 }
  0x62   : > { %s444_s27 = sshll.u32 %s436_s20, 4  ;;  %p4940_p2 = scmp.lt.s32.totalorder %s4003_s18, 4  ;;  %s445_s27 = int_to_ptr.vmem [resolvable:$true] %s444_s27 }
  0x63   : > { %4938 = sst [smem:[#allocation35_spill]] %s4937_s11  ;;  %s3364_s13 = smul.u32 3, %s4162_s21 }
  0x64   : > { %p4289_p3 = pnand %p4940_p2, %p4232_p10  ;;  %s433_s30 = scalar_lea.sflag [#allocation4], %s432_s5 }
  0x65   : > { %s3772_s11 = scalar_lea.vmem %s445_s27, 512  ;;  %s4011_s22 = smov [#allocation3]  }
  0x66   : > { %s443_s12 = scalar_lea.hbm %s4939_s0, %s3140_s6  ;;  %p3761_p8 = pneg %p4289_p3 }
  0x67   : > { %p3773_p9 = scmp.ne.s32.totalorder %s445_s27, %s3772_s11  ;;  %s3777_s6 = sshll.u32 %s4011_s22, 4  ;;  %s3778_s6 = int_to_ptr.vmem [resolvable:$false] %s3777_s6 }
  0x68   : > { %s3779_s19 = scalar_lea.vmem %s3778_s6, 1024  ;;  %p3780_p1 = scmp.lt.s32.totalorder %s445_s27, %s3778_s6 }
  0x69   : > { %p3775_p11 = pnand %p3773_p9, %p3761_p8  ;;  %p3781_p13 = scmp.lt.s32.totalorder %s3779_s19, %s3772_s11 }
  0x6b   : > { %p3776_p4 = pneg %p3775_p11  ;;  %p3782_p12 = por %p3781_p13, %p3780_p1 }
  0x6d   : > { %p3783_p10 = pnand %p3782_p12, %p3776_p4 }
  0x6f   : > { %3786 = shalt.err (!%p3783_p10)
}
  0x70   : > { %s4012_s4 = smov 128   ;;  %s4013_s5 = smov 8  }
  0x71   : > { %3385 = dma.hbm_to_vmem [thread:$0]  (!%p4289_p3), %s443_s12, 512, %s445_s27, %s433_s30, %s4012_s4, %s4012_s4, %s4013_s5  }
  0x72   : > { %s3365_s25 = smul.u32 48, %s3995_s16  ;;  %s479_s20 = scalar_lea.vmem [#allocation8], %s3364_s13 }
  0x73   : > { %s487_s22 = sshll.u32 %s479_s20, 4  ;;  %s3032_s0 = sshll.u32 %s4162_s21, 7  ;;  %s488_s22 = int_to_ptr.vmem [resolvable:$true] %s487_s22 }
  0x74   : > { %s4942_s2 = sld [smem:[#allocation39_spill]]  ;;  %s3800_s17 = scalar_lea.vmem %s488_s22, 48 }
  0x75   : > { %p3801_p13 = scmp.ne.s32.totalorder %s488_s22, %s3800_s17  ;;  %s4014_s28 = smov [#allocation8]  }
  0x76   : > { %s3805_s24 = sshll.u32 %s4014_s28, 4  ;;  %s3806_s24 = int_to_ptr.vmem [resolvable:$false] %s3805_s24 }
  0x77   : > { %p3803_p12 = pnand %p3801_p13, %p4181_p6  ;;  %s3807_s18 = scalar_lea.vmem %s3806_s24, 96 }
  0x78   : > { %p3808_p8 = scmp.lt.s32.totalorder %s488_s22, %s3806_s24  ;;  %p3809_p3 = scmp.lt.s32.totalorder %s3807_s18, %s3800_s17 }
  0x79   : > { %p3804_p2 = pneg %p3803_p12 }
  0x7a   : > { %s485_s19 = scalar_lea.hbm %s4942_s2, %s3365_s25  ;;  %p3810_p9 = por %p3809_p3, %p3808_p8 }
  0x7c   : > { %p3811_p11 = pnand %p3810_p9, %p3804_p2 }
  0x7e   : > { %3814 = shalt.err (!%p3811_p11)
}
  0x7f   : > { %3391 = dma.hbm_to_vmem [thread:$0]  (!%p4167_p5), %s485_s19, 48, %s488_s22, %s4177_s10  }
  0x80   : > { %s3142_s27 = sshll.u32 %s3995_s16, 11  ;;  %s4943_s12 = sld [smem:[#allocation42_spill]] }
  0x81   : > { %s525_s28 = scalar_lea.vmem [#allocation11], %s3032_s0  ;;  %s4015_s18 = smov [#allocation11]  }
  0x82   : > { %s532_s20 = sshll.u32 %s525_s28, 4  ;;  %s3833_s6 = sshll.u32 %s4015_s18, 4  ;;  %s533_s20 = int_to_ptr.vmem [resolvable:$true] %s532_s20  ;;  %s3834_s6 = int_to_ptr.vmem [resolvable:$false] %s3833_s6 }
  0x83   : > { %s3828_s17 = scalar_lea.vmem %s533_s20, 2048  ;;  %s3835_s11 = scalar_lea.vmem %s3834_s6, 4096 }
  0x84   : > { %p3829_p4 = scmp.ne.s32.totalorder %s533_s20, %s3828_s17  ;;  %p3836_p13 = scmp.lt.s32.totalorder %s533_s20, %s3834_s6 }
  0x85   : > { %p3837_p12 = scmp.lt.s32.totalorder %s3835_s11, %s3828_s17 }
  0x86   : > { %s531_s25 = scalar_lea.hbm %s4943_s12, %s3142_s27  ;;  %p3831_p1 = pnand %p3829_p4, %p4181_p6 }
  0x87   : > { %p3838_p2 = por %p3837_p12, %p3836_p13 }
  0x88   : > { %p3832_p10 = pneg %p3831_p1 }
  0x8a   : > { %p3839_p8 = pnand %p3838_p2, %p3832_p10 }
  0x8c   : > { %3842 = shalt.err (!%p3839_p8)
}
  0x8d   : > { %3397 = dma.hbm_to_vmem [thread:$0]  (!%p4167_p5), %s531_s25, 2048, %s533_s20, %s4203_s7, %s4012_s4, %s4012_s4, %s4013_s5  }
  0x8e   : > { %s4944_s19 = sld [smem:[#allocation44_spill]]  ;;  %s553_s30 = scalar_lea.vmem [#allocation12], %s3032_s0 }
  0x8f   : > { %s560_s13 = sshll.u32 %s553_s30, 4  ;;  %s550_s12 = scalar_lea.sflag [#allocation13], %s4162_s21  ;;  %s561_s13 = int_to_ptr.vmem [resolvable:$true] %s560_s13 }
  0x90   : > { %s3856_s28 = scalar_lea.vmem %s561_s13, 2048  ;;  %s4016_s17 = smov [#allocation12]  }
  0x91   : > { %p3857_p3 = scmp.ne.s32.totalorder %s561_s13, %s3856_s28  ;;  %s3861_s18 = sshll.u32 %s4016_s17, 4  ;;  %s3862_s18 = int_to_ptr.vmem [resolvable:$false] %s3861_s18 }
  0x92   : > { %s3863_s6 = scalar_lea.vmem %s3862_s18, 4096  ;;  %p3864_p4 = scmp.lt.s32.totalorder %s561_s13, %s3862_s18 }
  0x93   : > { %p3859_p9 = pnand %p3857_p3, %p4181_p6  ;;  %p3865_p1 = scmp.lt.s32.totalorder %s3863_s6, %s3856_s28 }
  0x94   : > { %s559_s24 = scalar_lea.hbm %s4944_s19, %s3142_s27 }
  0x95   : > { %p3860_p11 = pneg %p3859_p9  ;;  %p3866_p10 = por %p3865_p1, %p3864_p4 }
  0x97   : > { %p3867_p13 = pnand %p3866_p10, %p3860_p11 }
  0x99   : > { %3870 = shalt.err (!%p3867_p13)
}
  0x9a   : > { %s4945_s0 = smov 4   ;;  %s4946_s7 = smov 64  }
  0x9b   : > { %3400 = dma.hbm_to_vmem [thread:$0]  (!%p4167_p5), %s559_s24, 2048, %s561_s13, %s550_s12, %s4946_s7, %s4946_s7, %s4945_s0  }
  0x9c   : > { %602 = sbr.rel (%p4193_p7) target bundleno = 4201 (0x1069), region = 72 }
  0xa1   : > { %s4341_s9 = sand.u32 1, %s3979_s29   ;;  %p4947_p6 = scmp.ne.s32.totalorder %s4928_s15, 0 }
  0xa2   : > { %s4890_s21 = sshll.u32 %s4341_s9, 5  ;;  %s605_s4 = scalar_lea.sflag [#allocation4], %s4341_s9 }
  0xa3   : > { %s4347_s5 = scalar_lea.vmem [#allocation3], %s4890_s21 }
  0xa4   : > { %3942 = dma.done.wait (%p4947_p6), %s605_s4, 512  }
  0xa5   : > { %3944 = vsyncadd (%p4947_p6), %s605_s4, 4294966784  ;;  %s613_s23 = sand.u32 1, %s4214_s14   ;;  %s615_s8 = sand.u32 1, %s3967_s26  }
  0xa6   : > { %s3366_s27 = smul.u32 192, %s615_s8  ;;  %s614_s25 = scalar_lea.sflag [#allocation7], %s613_s23 }
  0xa8   : > { %s4355_s20 = scalar_lea.vmem [#allocation6], %s3366_s27 }
  0xa9   : > { %3946 = dma.done.wait (%p4258_p0), %s614_s25, 3120  }
  0xaa   : > { %3948 = vsyncadd (%p4258_p0), %s614_s25, 4294964176  ;;  %s3367_s11 = smul.u32 3, %s615_s8  ;;  %s3040_s10 = sshll.u32 %s615_s8, 6 }
  0xab   : > { %s632_s15 = scalar_lea.sflag [#allocation10], %s613_s23  ;;  %s4363_s19 = scalar_lea.vmem [#allocation9], %s3040_s10 }
  0xac   : > { %s4361_s22 = scalar_lea.vmem [#allocation8], %s3367_s11 }
  0xad   : > { %3950 = dma.done.wait (%p4258_p0), %s632_s15, 3072  }
  0xae   : > { %3952 = vsyncadd (%p4258_p0), %s632_s15, 4294964224  ;;  %s3041_s14 = sshll.u32 %s615_s8, 7  ;;  %s650_s30 = scalar_lea.sflag [#allocation13], %s615_s8 }
  0xaf   : > { %s4369_s24 = scalar_lea.vmem [#allocation11], %s3041_s14  ;;  %s4371_s13 = scalar_lea.vmem [#allocation12], %s3041_s14 }
  0xb0   : > { %3954 = dma.done.wait (%p4258_p0), %s650_s30, 2048  }
  0xb1   : > { %3956 = vsyncadd (%p4258_p0), %s650_s30, 4294965248  ;;  %s4948_s12 = sld [smem:[#allocation25_spill]] }
  0xb2   : > { %s4950_s23 = sld [smem:[#allocation43_spill]] }
  0xb3   : > { %s4952_s11 = sld [smem:[#allocation45_spill]] }
  0xb4   : > { %s4953_s30 = sld [smem:[#allocation46_spill]] }
  0xb5   : > { %s4954_s2 = sld [smem:[#allocation47_spill]] }
  0xb6   : > { %s4955_s0 = sld [smem:[#allocation48_spill]] }
  0xb7   : > { %p744_p5 = scmp.lt.s32.totalorder %s4948_s12, 1  ;;  %p3045_p7 = scmp.ne.s32.totalorder %s4948_s12, 0 }
  0xb9   : > { %s4379_s28 = scalar_select %p744_p5, %s4948_s12, 1 }
  0xbb   : > { %s3044_s7 = sshll.u32 %s4379_s28, 1  ;;  %s753_s10 = scalar_lea.vmem %s4952_s11, %s4379_s28 }
  0xbc   : > { %s4389_s8 = scalar_lea.vmem %s4950_s23, %s3044_s7  ;;  %s756_s17 = scalar_lea.vmem %s4953_s30, %s4379_s28 }
  0xbd   : > { %4951 = sst [smem:[#allocation36_spill]] %s4389_s8  ;;  %s759_s16 = scalar_lea.vmem %s4954_s2, %s4379_s28 }
  0xbe   : > { %s762_s26 = scalar_lea.vmem %s4955_s0, %s4379_s28  ;;  %s4956_s7 = sld [smem:[#allocation49_spill]] }
  0xbf   : > { %s4957_s23 = sshll.u32 %s4341_s9, 5 }
  0xc0   : > { %s4413_s8 = scalar_lea.vmem [#allocation14], %s4957_s23  ;;  %771 = sbr.rel (%p3045_p7) target bundleno = 200 (0xc8), region = 100 }
  0xc4   : > { %s765_s4 = scalar_lea.vmem %s4956_s7, %s4379_s28 }
  0xc5   : > { %v772_v0 = vld [vmem:[%s4347_s5] sm:$0xff]  ;;  %v773_v1 = vld [vmem:[%s4347_s5 + $0x8] sm:$0xff]  ;;  %v774_v2 = vld [vmem:[%s4347_s5 + $0x10] sm:$0xff] }
  0xc6   : > { %776 = vst [vmem:[#allocation2 + $0x10] sm:$0xff] %v772_v0  ;;  %777 = vst [vmem:[#allocation2] sm:$0xff] %v773_v1  ;;  %v775_v3 = vld [vmem:[%s4347_s5 + $0x18] sm:$0xff] }
  0xc7   : > { %778 = vst [vmem:[#allocation2 + $0x18] sm:$0xff] %v774_v2  ;;  %779 = vst [vmem:[#allocation2 + $0x8] sm:$0xff] %v775_v3 }
  0xc8 PF: > { %v3539_v4 = vld [vmem:[%s4355_s20 + $0xac] ss:$12 sps:$4 sm:$0xff]   ;;  %v3541_v5 = vld [vmem:[%s4355_s20 + $0xa8] ss:$12 sps:$4 sm:$0xff]   ;;  %v4017_v6 = vmov 0   ;;  %v4018_v27 = vmov 0.0   ;;  %v891_v28 = vlaneseq }
  0xc9   : > { %1066 = vmatprep.mubr.bf16.mxu0 %v4017_v6  ;;  %1034 = vmatprep.subr.bf16.mxu0 %v3539_v4  ;;  %v3542_v7 = vld [vmem:[%s4355_s20 + $0x94] ss:$12 sps:$4 sm:$0xff]   ;;  %v3544_v8 = vld [vmem:[%s4355_s20 + $0x90] ss:$12 sps:$4 sm:$0xff]   ;;  %v3547_v10 = vld [vmem:[%s4355_s20 + $0x78] ss:$12 sps:$4 sm:$0xff]  }
  0xca   : > { %1035 = vmatpush1.bf16.msra.mxu0 %v3541_v5  ;;  %v3545_v9 = vld [vmem:[%s4355_s20 + $0x7c] ss:$12 sps:$4 sm:$0xff]   ;;  %v3548_v11 = vld [vmem:[%s4355_s20 + $0x64] ss:$12 sps:$4 sm:$0xff]   ;;  %v3550_v13 = vld [vmem:[%s4355_s20 + $0x60] ss:$12 sps:$4 sm:$0xff]  }
  0xcb   : > { %1036 = vmatprep.subr.bf16.mxu0 %v3542_v7  ;;  %v3551_v15 = vld [vmem:[%s4355_s20 + $0x4c] ss:$12 sps:$4 sm:$0xff]   ;;  %v3553_v17 = vld [vmem:[%s4355_s20 + $0x48] ss:$12 sps:$4 sm:$0xff]   ;;  %v3556_v19 = vld [vmem:[%s4355_s20 + $0x30] ss:$12 sps:$4 sm:$0xff]  }
  0xcc   : > { %v3554_v18 = vld [vmem:[%s4355_s20 + $0x34] ss:$12 sps:$4 sm:$0xff]   ;;  %v3557_v20 = vld [vmem:[%s4355_s20 + $0x1c] ss:$12 sps:$4 sm:$0xff]   ;;  %v3559_v21 = vld [vmem:[%s4355_s20 + $0x18] ss:$12 sps:$4 sm:$0xff]  }
  0xcd   : > { %v780_v12 = vld [vmem:[#allocation2 + $0x10] sm:$0xff]  ;;  %v781_v14 = vld [vmem:[#allocation2] sm:$0xff]  ;;  %vm4019_vm0 = vmmov 0   ;;  %v4444_v29 = vshrl.u32 %v891_v28, 7  ;;  %vm1140_vm1 = vcmask 261120   ;;  %vm1239_vm2 = vcmask 130048  }
  0xce   : > { %1037 = vmatpush1.bf16.msra.mxu0 %v3544_v8  ;;  %v888_v16 = vpack.c.bf16 %v781_v14, %v780_v12  ;;  %v3560_v22 = vld [vmem:[%s4355_s20 + $0x4] ss:$12 sps:$4 sm:$0xff]   ;;  %v3562_v23 = vld [vmem:[%s4355_s20] ss:$12 sps:$4 sm:$0xff]   ;;  %v782_v24 = vld [vmem:[#allocation2 + $0x18] sm:$0xff]  ;;  %s4020_s2 = smov 96  }
  0xcf   : > { %1038 = vmatprep.subr.bf16.mxu0 %v3545_v9  ;;  %v783_v25 = vld [vmem:[#allocation2 + $0x8] sm:$0xff]  ;;  %v897_v30 = vsub.s32 1, %v4444_v29  ;;  %v4448_v32 = vld [vmem:[%s4361_s22] sm:$0x7]  ;;  %v893_v37 = vsub.s32 0, %v4444_v29  ;;  %s4021_s3 = smov 64  }
  0xd0   : > { %3242 = vmatprep.mubr.bf16.mxu1 %v888_v16  ;;  %v4438_v26 = vpack.c.bf16 %v783_v25, %v782_v24  ;;  %v3563_v57 = vld [vmem:[%s4355_s20 + $0xb0] ss:$12 sps:$4 sm:$0xff]   ;;  %v3564_v58 = vld [vmem:[%s4355_s20 + $0x98] ss:$12 sps:$4 sm:$0xff]   ;;  %v3565_v59 = vld [vmem:[%s4355_s20 + $0x80] ss:$12 sps:$4 sm:$0xff]  }
  0xd1   : > { %v898_v34 = vrot.slane %v4448_v32, %v897_v30  ;;  %v894_v43 = vrot.slane %v4448_v32, %v893_v37  ;;  %3226 = vmatprep.subr.bf16.mxu1 %v3563_v57  ;;  %v3566_v60 = vld [vmem:[%s4355_s20 + $0x68] ss:$12 sps:$4 sm:$0xff]   ;;  %v3567_v61 = vld [vmem:[%s4355_s20 + $0x50] ss:$12 sps:$4 sm:$0xff]   ;;  %v3568_v62 = vld [vmem:[%s4355_s20 + $0x38] ss:$12 sps:$4 sm:$0xff]  }
  0xd2   : > { %1039 = vmatpush1.bf16.msra.mxu0 %v3547_v10  ;;  %3227 = vmatpush3.bf16.msra.mxu1 %v3563_v57  ;;  %v3569_v63 = vld [vmem:[%s4355_s20 + $0x20] ss:$12 sps:$4 sm:$0xff]   ;;  %v3570_v0 = vld [vmem:[%s4355_s20 + $0x8] ss:$12 sps:$4 sm:$0xff]   ;;  %s4022_s29 = smov 32   ;;  %vm2172_vm3 = vcmask 523264  }
  0xd3   : > { %1040 = vmatprep.subr.bf16.mxu0 %v3548_v11  ;;  %3228 = vmatprep.subr.bf16.mxu1 %v3564_v58  ;;  %vm2177_vm4 = vcmask 785408   ;;  %s4958_s20 = sld [smem:[#allocation41_spill]] }
  0xd6   : > { %1041 = vmatpush1.bf16.msra.mxu0 %v3550_v13  ;;  %3229 = vmatpush3.bf16.msra.mxu1 %v3564_v58 }
  0xd7   : > { %1042 = vmatprep.subr.bf16.mxu0 %v3551_v15  ;;  %3230 = vmatprep.subr.bf16.mxu1 %v3565_v59 }
  0xd9   : > { %s4959_s22 = scalar_lea.vmem %s4958_s20, %s4379_s28 }
  0xda   : > { %1043 = vmatpush1.bf16.msra.mxu0 %v3553_v17  ;;  %3231 = vmatpush3.bf16.msra.mxu1 %v3565_v59 }
  0xdb   : > { %1044 = vmatprep.subr.bf16.mxu0 %v3554_v18  ;;  %3232 = vmatprep.subr.bf16.mxu1 %v3566_v60 }
  0xde   : > { %1045 = vmatpush1.bf16.msra.mxu0 %v3556_v19  ;;  %3233 = vmatpush3.bf16.msra.mxu1 %v3566_v60 }
  0xdf   : > { %1046 = vmatprep.subr.bf16.mxu0 %v3557_v20  ;;  %3234 = vmatprep.subr.bf16.mxu1 %v3567_v61 }
  0xe2   : > { %1047 = vmatpush1.bf16.msra.mxu0 %v3559_v21  ;;  %3235 = vmatpush3.bf16.msra.mxu1 %v3567_v61 }
  0xe3   : > { %1048 = vmatprep.subr.bf16.mxu0 %v3560_v22  ;;  %3236 = vmatprep.subr.bf16.mxu1 %v3568_v62 }
  0xe6   : > { %1049 = vmatpush1.bf16.msra.mxu0 %v3562_v23  ;;  %3237 = vmatpush3.bf16.msra.mxu1 %v3568_v62 }
  0xe7   : > { %3246 = vmatprep.subr.bf16.mxu0 %v4018_v27  ;;  %3238 = vmatprep.subr.bf16.mxu1 %v3569_v63 }
  0xe9   : > { %1067 = vmatmul.mubr.bf16.vlgmr.msra.gmra.mxu0 %v888_v16 }
  0xea   : > { %1076 = vmatprep.mubr.bf16.mxu0 %v4017_v6  ;;  %3239 = vmatpush3.bf16.msra.mxu1 %v3569_v63 }
  0xeb   : > { %3240 = vmatprep.subr.bf16.mxu1 %v3570_v0 }
  0xee   : > { %3241 = vmatpush3.bf16.msra.mxu1 %v3570_v0 }
  0xef   : > { %3258 = vmatprep.subr.bf16.mxu1 %v4018_v27 }
  0xf1   : > { %1077 = vmatmul.mubr.bf16.gmra.mxu0 %v4438_v26  ;;  %3243 = vmatmul.mubr.bf16.vlgmr.msra.gmra.mxu1 %v4438_v26 }
  0xf2   : > { %3248 = vmatprep.mubr.msk.bf16.mxu0 %vm4019_vm0, %v4018_v27  ;;  %3260 = vmatprep.mubr.msk.bf16.mxu1 %vm4019_vm0, %v4018_v27 }
 0x1a9   : > { %v1068_v31 = vpop.f32.mrf.mxu0 }
 0x1aa   : > { %v1069_v49 = vadd.f32 %v1068_v31, %v894_v43 }
 0x1ab   : > { %v1070_v33 = vpop.f32.mrf.mxu0 }
 0x1ac   : > { %v1071_v38 = vadd.f32 %v1070_v33, %v898_v34 }
 0x1ad   : > { %v1072_v35 = vpop.f32.mrf.mxu0 }
 0x1ae   : > { %v1073_v46 = vadd.f32 %v1072_v35, %v894_v43 }
 0x1af   : > { %v1074_v36 = vpop.f32.mrf.mxu0 }
 0x1b0   : > { %v1075_v39 = vadd.f32 %v1074_v36, %v898_v34  ;;  %v4462_v51 = vpack.c.bf16 %v1073_v46, %v1069_v49 }
 0x1b1   : > { %v1078_v40 = vpop.f32.mrf.mxu0 }
 0x1b2   : > { %v4454_v41 = vpack.c.bf16 %v1075_v39, %v1071_v38  ;;  %v1079_v53 = vadd.f32 %v1078_v40, %v894_v43  ;;  %v901_v38 = vsub.s32 2, %v4444_v29  ;;  %v3244_v39 = vpop.f32.mrf.mxu1 }
 0x1b3   : > { %v1080_v42 = vpop.f32.mrf.mxu0 }
 0x1b4   : > { %v1145_v44 = vsel %vm1140_vm1, %v4454_v41, 0  ;;  %v1081_v47 = vadd.f32 %v1080_v42, %v898_v34  ;;  %v902_v40 = vrot.slane %v4448_v32, %v901_v38  ;;  %v1121_v42 = vpop.f32.mrf.mxu1 }
 0x1b5   : > { %v1082_v45 = vpop.f32.mrf.mxu0  ;;  %3247 = vmatpush3.bf16.xpose.msra.mxu0 %v1145_v44 }
 0x1b6   : > { %3252 = vmatprep.subr.bf16.mxu0 %v4018_v27  ;;  %v1083_v54 = vadd.f32 %v1082_v45, %v894_v43  ;;  %v1130_v43 = vadd.f32 %v3244_v39, %v902_v40  ;;  %v3245_v44 = vpop.f32.mrf.mxu1  ;;  %v1122_v45 = vadd.f32 %v1121_v42, %v902_v40 }
 0x1b7   : > { %v1084_v48 = vpop.f32.mrf.mxu0  ;;  %v1133_v46 = vadd.f32 %v3245_v44, %v902_v40 }
 0x1b8   : > { %v1085_v50 = vadd.f32 %v1084_v48, %v898_v34  ;;  %v4473_v56 = vpack.c.bf16 %v1083_v54, %v1079_v53 }
 0x1b9   : > { %v4502_v48 = vpack.c.bf16 %v1133_v46, %v1130_v43 }
 0x1ba   : > { %v4464_v52 = vpack.c.bf16 %v1085_v50, %v1081_v47  ;;  %v1124_v47 = vpop.f32.mrf.mxu1 }
 0x1bb   : > { %v1125_v49 = vadd.f32 %v1124_v47, %v902_v40 }
 0x1bc   : > { %3249 = vmatmul.mubr.msk.bf16.vlgmr.msra.gmra.mxu0 %vm1140_vm1, %v4462_v51  ;;  %v1192_v55 = vsel %vm1140_vm1, %v4464_v52, 0 }
 0x1bd   : > { %3253 = vmatpush3.bf16.xpose.msra.mxu0 %v1192_v55  ;;  %3254 = vmatprep.mubr.msk.bf16.mxu0 %vm4019_vm0, %v4018_v27  ;;  %v4504_v50 = vpack.c.bf16 %v1125_v49, %v1122_v45 }
 0x1be   : > { %3264 = vmatprep.subr.bf16.mxu0 %v4018_v27 }
 0x1bf   : > { %3259 = vmatpush3.bf16.msra.mxu1 %v4504_v50 }
 0x1c0   : > { %3270 = vmatprep.subr.bf16.mxu1 %v4018_v27 }
 0x1c4   : > { %3255 = vmatmul.mubr.msk.bf16.vlgmr.msra.gmra.mxu0 %vm1140_vm1, %v4473_v56 }
 0x1c5   : > { %3266 = vmatprep.mubr.msk.bf16.mxu0 %vm4019_vm0, %v4018_v27  ;;  %3265 = vmatpush3.bf16.msra.mxu0 %v4502_v48 }
 0x1c6   : > { %3276 = vmatprep.subr.bf16.mxu0 %v4018_v27 }
 0x27c   : > { %v1181_v1 = vpop.f32.mrf.mxu0 }
 0x27d   : > { %v1235_v2 = vmul.f32 0.17677669, %v1181_v1 }
 0x27e   : > { %v3250_v3 = vpop.f32.mrf.mxu0 }
 0x27f   : > { %v1240_v4 = vsel %vm1239_vm2, %v1235_v2, -inf }
 0x280   : > { %1241 = vmax.xlane.f32.xlu0 %v1240_v4  ;;  %v1184_v5 = vpop.f32.mrf.mxu0 }
 0x281   : > { %v1236_v7 = vmul.f32 0.17677669, %v1184_v5 }
 0x282   : > { %v3251_v8 = vpop.f32.mrf.mxu0 }
 0x283   : > { %v1243_v9 = vsel %vm1239_vm2, %v1236_v7, -inf }
 0x284   : > { %1244 = vmax.xlane.f32.xlu0 %v1243_v9  ;;  %v1228_v10 = vpop.f32.mrf.mxu0 }
 0x285   : > { %v1237_v11 = vmul.f32 0.17677669, %v1228_v10 }
 0x286   : > { %v3256_v12 = vpop.f32.mrf.mxu0 }
 0x287   : > { %v1246_v13 = vsel %vm1239_vm2, %v1237_v11, -inf }
 0x288   : > { %1247 = vmax.xlane.f32.xlu1 %v1246_v13  ;;  %v1231_v14 = vpop.f32.mrf.mxu0 }
 0x289   : > { %v1238_v15 = vmul.f32 0.17677669, %v1231_v14 }
 0x28a   : > { %v3257_v16 = vpop.f32.mrf.mxu0 }
 0x28b   : > { %v1249_v17 = vsel %vm1239_vm2, %v1238_v15, -inf }
 0x28c   : > { %1250 = vmax.xlane.f32.xlu1 %v1249_v17 }
 0x309   : > { %v1242_v18 = vpop.xlane.xlu0 %1241 }
 0x30a   : > { %v1252_v19 = vsub.f32 %v1235_v2, %v1242_v18 }
 0x30c   : > { %v1256_v20 = vmul.f32 1.442695, %v1252_v19 }
 0x30d   : > { %v1245_v21 = vpop.xlane.xlu0 %1244 }
 0x30e   : > { %3619 = vpow2.f32 %v1256_v20  ;;  %v1253_v22 = vsub.f32 %v1236_v7, %v1245_v21 }
 0x310   : > { %v1258_v23 = vmul.f32 1.442695, %v1253_v22 }
 0x311   : > { %v1248_v24 = vpop.xlane.xlu1 %1247 }
 0x312   : > { %3621 = vpow2.f32 %v1258_v23  ;;  %v1254_v25 = vsub.f32 %v1237_v11, %v1248_v24 }
 0x314   : > { %v1260_v26 = vmul.f32 1.442695, %v1254_v25 }
 0x315   : > { %v1251_v32 = vpop.xlane.xlu1 %1250 }
 0x316   : > { %3623 = vpow2.f32 %v1260_v26  ;;  %v1255_v53 = vsub.f32 %v1238_v15, %v1251_v32 }
 0x318   : > { %v1262_v54 = vmul.f32 1.442695, %v1255_v53 }
 0x31a   : > { %3625 = vpow2.f32 %v1262_v54 }
 0x31b   : > { %v3620_v28 = vpop.eup %3619 }
 0x31c   : > { %v1264_v31 = vsel %vm1239_vm2, %v3620_v28, 0.0 }
 0x31d   : > { %1265 = vadd.xlane.f32.xlu0 %v1264_v31 }
 0x31f   : > { %v3622_v33 = vpop.eup %3621 }
 0x320   : > { %v1267_v34 = vsel %vm1239_vm2, %v3622_v33, 0.0 }
 0x321   : > { %1268 = vadd.xlane.f32.xlu1 %v1267_v34 }
 0x323   : > { %v3624_v35 = vpop.eup %3623 }
 0x324   : > { %v1270_v36 = vsel %vm1239_vm2, %v3624_v35, 0.0 }
 0x325   : > { %1271 = vadd.xlane.f32.xlu0 %v1270_v36 }
 0x327   : > { %v3626_v55 = vpop.eup %3625 }
 0x328   : > { %v1273_v57 = vsel %vm1239_vm2, %v3626_v55, 0.0 }
 0x332   : > { %1433 = vrot.lane.b32.xlu1 %v4464_v52, %s4020_s2 }
 0x33b   : > { %1380 = vrot.lane.b32.xlu0 %v4454_v41, %s4020_s2 }
 0x356   : > { %1274 = vadd.xlane.f32.xlu1 %v1273_v57 }
 0x367   : > { %1377 = vrot.lane.b32.xlu1 %v4462_v51, %s4020_s2 }
 0x36b   : > { %1430 = vrot.lane.b32.xlu1 %v4473_v56, %s4020_s2 }
 0x3a6   : > { %v1266_v58 = vpop.xlane.xlu0 %1265 }
 0x3a7   : > { %3627 = vrcp.f32 %v1266_v58 }
 0x3aa   : > { %v1269_v59 = vpop.xlane.xlu1 %1268 }
 0x3ab   : > { %3629 = vrcp.f32 %v1269_v59 }
 0x3ae   : > { %v1272_v60 = vpop.xlane.xlu0 %1271  ;;  %v1434_v4 = vpop.permute.xlu1 %1433 }
 0x3af   : > { %3631 = vrcp.f32 %v1272_v60  ;;  %v1439_v13 = vsel %vm1140_vm1, %v1434_v4, 0 }
 0x3b2   : > { %v1381_v1 = vpop.permute.xlu0 %1380 }
 0x3b3   : > { %v1386_v3 = vsel %vm1140_vm1, %v1381_v1, 0 }
 0x3b4   : > { %v3628_v61 = vpop.eup %3627 }
 0x3b5   : > { %v1280_v63 = vmul.f32 %v3628_v61, %v3620_v28 }
 0x3b8   : > { %v3630_v62 = vpop.eup %3629 }
 0x3b9   : > { %v1281_v0 = vmul.f32 %v3630_v62, %v3622_v33 }
 0x3bb   : > { %v1284_v2 = vpack.c.bf16 %v1281_v0, %v1280_v63 }
 0x3bc   : > { %v3632_v8 = vpop.eup %3631 }
 0x3bd   : > { %3261 = vmatmul.mubr.msk.bf16.vlgmr.msra.gmra.mxu1 %vm1239_vm2, %v1284_v2  ;;  %v1282_v10 = vmul.f32 %v3632_v8, %v3624_v35 }
 0x3be   : > { %3271 = vmatpush3.bf16.xpose.msra.mxu1 %v1386_v3  ;;  %3272 = vmatprep.mubr.msk.bf16.mxu1 %vm4019_vm0, %v4018_v27 }
 0x3bf   : > { %3282 = vmatprep.subr.bf16.mxu1 %v4018_v27 }
 0x3df   : > { %v1275_v5 = vpop.xlane.xlu1 %1274 }
 0x3e0   : > { %3633 = vrcp.f32 %v1275_v5 }
 0x3e3   : > { %v1378_v7 = vpop.permute.xlu1 %1377 }
 0x3e4   : > { %3273 = vmatmul.mubr.msk.bf16.vlgmr.msra.gmra.mxu1 %vm1140_vm1, %v1378_v7 }
 0x3e5   : > { %3284 = vmatprep.mubr.msk.bf16.mxu1 %vm4019_vm0, %v4018_v27 }
 0x3e7   : > { %v1431_v14 = vpop.permute.xlu1 %1430 }
 0x3ed   : > { %v3634_v9 = vpop.eup %3633 }
 0x3ee   : > { %v1283_v11 = vmul.f32 %v3634_v9, %v3626_v55 }
 0x3f0   : > { %v1285_v12 = vpack.c.bf16 %v1283_v11, %v1282_v10 }
 0x3f2   : > { %3267 = vmatmul.mubr.msk.bf16.vlgmr.msra.gmra.mxu0 %vm1239_vm2, %v1285_v12 }
 0x3f3   : > { %3277 = vmatpush3.bf16.xpose.msra.mxu0 %v1439_v13  ;;  %3278 = vmatprep.mubr.msk.bf16.mxu0 %vm4019_vm0, %v4018_v27 }
 0x3f4   : > { %3288 = vmatprep.subr.bf16.mxu0 %v4018_v27 }
 0x3fa   : > { %3279 = vmatmul.mubr.msk.bf16.vlgmr.msra.gmra.mxu0 %vm1140_vm1, %v1431_v14 }
 0x3fb   : > { %3290 = vmatprep.mubr.msk.bf16.mxu0 %vm4019_vm0, %v4018_v27 }
 0x47d   : > { %v4533_v15 = vpop.f32.mrf.mxu1 }
 0x47f   : > { %v3262_v16 = vpop.f32.mrf.mxu1 }
 0x481   : > { %v4535_v17 = vpop.f32.mrf.mxu1 }
 0x483   : > { %v3263_v18 = vpop.f32.mrf.mxu1 }
 0x4a4   : > { %v1422_v19 = vpop.f32.mrf.mxu1 }
 0x4a5   : > { %v1482_v20 = vmul.f32 0.17677669, %v1422_v19 }
 0x4a6   : > { %v3274_v21 = vpop.f32.mrf.mxu1 }
 0x4a7   : > { %v1486_v22 = vsel %vm1239_vm2, %v1482_v20, -inf }
 0x4a8   : > { %1487 = vmax.xlane.f32.xlu0 %v1486_v22  ;;  %v1425_v23 = vpop.f32.mrf.mxu1 }
 0x4a9   : > { %v1483_v24 = vmul.f32 0.17677669, %v1425_v23 }
 0x4aa   : > { %v3275_v25 = vpop.f32.mrf.mxu1 }
 0x4ab   : > { %v1489_v26 = vsel %vm1239_vm2, %v1483_v24, -inf }
 0x4ac   : > { %1490 = vmax.xlane.f32.xlu1 %v1489_v26 }
 0x4b2   : > { %v4539_v28 = vpop.f32.mrf.mxu0 }
 0x4b4   : > { %v3268_v31 = vpop.f32.mrf.mxu0 }
 0x4b6   : > { %v4541_v33 = vpop.f32.mrf.mxu0 }
 0x4b8   : > { %v3269_v34 = vpop.f32.mrf.mxu0 }
 0x4ba   : > { %v1475_v35 = vpop.f32.mrf.mxu0 }
 0x4bb   : > { %v1484_v36 = vmul.f32 0.17677669, %v1475_v35 }
 0x4bc   : > { %v3280_v38 = vpop.f32.mrf.mxu0 }
 0x4bd   : > { %v1492_v39 = vsel %vm1239_vm2, %v1484_v36, -inf }
 0x4be   : > { %1493 = vmax.xlane.f32.xlu0 %v1492_v39  ;;  %v1478_v40 = vpop.f32.mrf.mxu0 }
 0x4bf   : > { %v1485_v42 = vmul.f32 0.17677669, %v1478_v40 }
 0x4c0   : > { %v3281_v43 = vpop.f32.mrf.mxu0 }
 0x4c1   : > { %v1495_v44 = vsel %vm1239_vm2, %v1485_v42, -inf }
 0x4c2   : > { %1496 = vmax.xlane.f32.xlu0 %v1495_v44 }
 0x531   : > { %v1488_v45 = vpop.xlane.xlu0 %1487 }
 0x532   : > { %v1498_v46 = vsub.f32 %v1482_v20, %v1488_v45 }
 0x534   : > { %v1502_v47 = vmul.f32 1.442695, %v1498_v46 }
 0x535   : > { %v1491_v49 = vpop.xlane.xlu1 %1490 }
 0x536   : > { %3635 = vpow2.f32 %v1502_v47  ;;  %v1499_v32 = vsub.f32 %v1483_v24, %v1491_v49 }
 0x538   : > { %v1504_v53 = vmul.f32 1.442695, %v1499_v32 }
 0x53a   : > { %3637 = vpow2.f32 %v1504_v53 }
 0x543   : > { %v3636_v54 = vpop.eup %3635 }
 0x544   : > { %v1510_v55 = vsel %vm1239_vm2, %v3636_v54, 0.0 }
 0x545   : > { %1511 = vadd.xlane.f32.xlu0 %v1510_v55 }
 0x547   : > { %v3638_v57 = vpop.eup %3637  ;;  %v1494_v58 = vpop.xlane.xlu0 %1493 }
 0x548   : > { %v1500_v59 = vsub.f32 %v1484_v36, %v1494_v58  ;;  %v1513_v60 = vsel %vm1239_vm2, %v3638_v57, 0.0 }
 0x549   : > { %1514 = vadd.xlane.f32.xlu1 %v1513_v60 }
 0x54a   : > { %v1506_v61 = vmul.f32 1.442695, %v1500_v59 }
 0x54b   : > { %v1497_v0 = vpop.xlane.xlu0 %1496 }
 0x54c   : > { %3639 = vpow2.f32 %v1506_v61  ;;  %v1501_v1 = vsub.f32 %v1485_v42, %v1497_v0 }
 0x54e   : > { %v1508_v2 = vmul.f32 1.442695, %v1501_v1 }
 0x550   : > { %3641 = vpow2.f32 %v1508_v2 }
 0x559   : > { %v3640_v62 = vpop.eup %3639 }
 0x55a   : > { %1581 = vrot.lane.b32.xlu1 %v4502_v48, %s4020_s2  ;;  %v1516_v63 = vsel %vm1239_vm2, %v3640_v62, 0.0 }
 0x55b   : > { %1517 = vadd.xlane.f32.xlu0 %v1516_v63 }
 0x55d   : > { %v3642_v3 = vpop.eup %3641 }
 0x55e   : > { %1630 = vrot.lane.b32.xlu1 %v4454_v41, %s4021_s3  ;;  %v1519_v4 = vsel %vm1239_vm2, %v3642_v3, 0.0 }
 0x571   : > { %1533 = vrot.lane.b32.xlu0 %v4504_v50, %s4020_s2 }
 0x575   : > { %1628 = vrot.lane.b32.xlu0 %v4462_v51, %s4021_s3 }
 0x582   : > { %1520 = vadd.xlane.f32.xlu1 %v1519_v4 }
 0x593   : > { %1681 = vrot.lane.b32.xlu1 %v4464_v52, %s4021_s3 }
 0x597   : > { %1679 = vrot.lane.b32.xlu1 %v4473_v56, %s4021_s3 }
 0x5ce   : > { %v1512_v7 = vpop.xlane.xlu0 %1511 }
 0x5d2   : > { %v1515_v5 = vpop.xlane.xlu1 %1514 }
 0x5d3   : > { %3643 = vrcp.f32 %v1515_v5 }
 0x5d4   : > { %3645 = vrcp.f32 %v1512_v7 }
 0x5d6   : > { %v1582_v8 = vpop.permute.xlu1 %1581 }
 0x5d7   : > { %3289 = vmatpush3.bf16.msra.mxu0 %v1582_v8 }
 0x5d8   : > { %3300 = vmatprep.subr.bf16.mxu0 %v4018_v27 }
 0x5da   : > { %v1631_v16 = vpop.permute.xlu1 %1630 }
 0x5db   : > { %v1636_v19 = vsel %vm1140_vm1, %v1631_v16, 0 }
 0x5e0   : > { %v3644_v9 = vpop.eup %3643 }
 0x5e1   : > { %v3646_v11 = vpop.eup %3645  ;;  %v1527_v12 = vmul.f32 %v3644_v9, %v3638_v57 }
 0x5e2   : > { %v1526_v14 = vmul.f32 %v3646_v11, %v3636_v54 }
 0x5e4   : > { %v1518_v10 = vpop.xlane.xlu0 %1517  ;;  %v1530_v18 = vpack.c.bf16 %v1527_v12, %v1526_v14 }
 0x5e5   : > { %3647 = vrcp.f32 %v1518_v10 }
 0x5e8   : > { %v1534_v13 = vpop.permute.xlu0 %1533 }
 0x5e9   : > { %3283 = vmatpush3.bf16.msra.mxu1 %v1534_v13 }
 0x5ea   : > { %3294 = vmatprep.subr.bf16.mxu1 %v4018_v27 }
 0x5ec   : > { %3285 = vmatmul.mubr.msk.bf16.vlgmr.msra.gmra.mxu1 %vm1239_vm2, %v1530_v18  ;;  %v1629_v20 = vpop.permute.xlu0 %1628 }
 0x5ed   : > { %3295 = vmatpush3.bf16.xpose.msra.mxu1 %v1636_v19  ;;  %3296 = vmatprep.mubr.msk.bf16.mxu1 %vm4019_vm0, %v4018_v27 }
 0x5ee   : > { %3306 = vmatprep.subr.bf16.mxu1 %v4018_v27 }
 0x5f2   : > { %v3648_v22 = vpop.eup %3647 }
 0x5f3   : > { %v1528_v24 = vmul.f32 %v3648_v22, %v3640_v62 }
 0x5f4   : > { %3297 = vmatmul.mubr.msk.bf16.vlgmr.msra.gmra.mxu1 %vm1140_vm1, %v1629_v20 }
 0x5f5   : > { %3308 = vmatprep.mubr.msk.bf16.mxu1 %vm4019_vm0, %v4018_v27 }
 0x60b   : > { %v1521_v21 = vpop.xlane.xlu1 %1520 }
 0x60c   : > { %3649 = vrcp.f32 %v1521_v21 }
 0x60f   : > { %v1682_v26 = vpop.permute.xlu1 %1681 }
 0x610   : > { %v1687_v34 = vsel %vm1140_vm1, %v1682_v26, 0 }
 0x613   : > { %v1680_v35 = vpop.permute.xlu1 %1679 }
 0x619   : > { %v3650_v23 = vpop.eup %3649 }
 0x61a   : > { %v1529_v25 = vmul.f32 %v3650_v23, %v3642_v3 }
 0x61c   : > { %v1531_v31 = vpack.c.bf16 %v1529_v25, %v1528_v24 }
 0x61e   : > { %3291 = vmatmul.mubr.msk.bf16.vlgmr.msra.gmra.mxu0 %vm1239_vm2, %v1531_v31 }
 0x61f   : > { %3301 = vmatpush3.bf16.xpose.msra.mxu0 %v1687_v34  ;;  %3302 = vmatprep.mubr.msk.bf16.mxu0 %vm4019_vm0, %v4018_v27 }
 0x620   : > { %3312 = vmatprep.subr.bf16.mxu0 %v4018_v27 }
 0x626   : > { %3303 = vmatmul.mubr.msk.bf16.vlgmr.msra.gmra.mxu0 %vm1140_vm1, %v1680_v35 }
 0x627   : > { %3314 = vmatprep.mubr.msk.bf16.mxu0 %vm4019_vm0, %v4018_v27 }
 0x6ac   : > { %v4579_v36 = vpop.f32.mrf.mxu1 }
 0x6ae   : > { %v3286_v38 = vpop.f32.mrf.mxu1 }
 0x6b0   : > { %v4581_v39 = vpop.f32.mrf.mxu1 }
 0x6b1   : > { %v3509_v40 = vpack.i.bf16 %v4581_v39, %v4579_v36 }
 0x6b2   : > { %v3287_v42 = vpop.f32.mrf.mxu1 }
 0x6b4   : > { %v1672_v43 = vpop.f32.mrf.mxu1 }
 0x6b5   : > { %v1730_v44 = vmul.f32 0.17677669, %v1672_v43 }
 0x6b6   : > { %v3298_v45 = vpop.f32.mrf.mxu1 }
 0x6b7   : > { %v1734_v46 = vsel %vm1239_vm2, %v1730_v44, -inf }
 0x6b8   : > { %1735 = vmax.xlane.f32.xlu0 %v1734_v46  ;;  %v1675_v47 = vpop.f32.mrf.mxu1 }
 0x6b9   : > { %v1731_v49 = vmul.f32 0.17677669, %v1675_v47 }
 0x6ba   : > { %v3299_v32 = vpop.f32.mrf.mxu1 }
 0x6bb   : > { %v1737_v53 = vsel %vm1239_vm2, %v1731_v49, -inf }
 0x6bc   : > { %1738 = vmax.xlane.f32.xlu1 %v1737_v53 }
 0x6de   : > { %v4587_v54 = vpop.f32.mrf.mxu0 }
 0x6e0   : > { %v3292_v55 = vpop.f32.mrf.mxu0 }
 0x6e2   : > { %v4589_v57 = vpop.f32.mrf.mxu0 }
 0x6e3   : > { %v3514_v58 = vpack.i.bf16 %v4589_v57, %v4587_v54 }
 0x6e4   : > { %v3293_v59 = vpop.f32.mrf.mxu0 }
 0x6e6   : > { %v1723_v60 = vpop.f32.mrf.mxu0 }
 0x6e7   : > { %v1732_v61 = vmul.f32 0.17677669, %v1723_v60 }
 0x6e8   : > { %v3304_v62 = vpop.f32.mrf.mxu0 }
 0x6e9   : > { %v1740_v63 = vsel %vm1239_vm2, %v1732_v61, -inf }
 0x6ea   : > { %1741 = vmax.xlane.f32.xlu0 %v1740_v63  ;;  %v1726_v0 = vpop.f32.mrf.mxu0 }
 0x6eb   : > { %v1733_v1 = vmul.f32 0.17677669, %v1726_v0 }
 0x6ec   : > { %v3305_v2 = vpop.f32.mrf.mxu0 }
 0x6ed   : > { %v1743_v3 = vsel %vm1239_vm2, %v1733_v1, -inf }
 0x6ee   : > { %1744 = vmax.xlane.f32.xlu0 %v1743_v3 }
 0x741   : > { %v1736_v4 = vpop.xlane.xlu0 %1735 }
 0x742   : > { %v1746_v5 = vsub.f32 %v1730_v44, %v1736_v4 }
 0x744   : > { %v1750_v7 = vmul.f32 1.442695, %v1746_v5 }
 0x745   : > { %v1739_v8 = vpop.xlane.xlu1 %1738 }
 0x746   : > { %3651 = vpow2.f32 %v1750_v7  ;;  %v1747_v9 = vsub.f32 %v1731_v49, %v1739_v8 }
 0x748   : > { %v1752_v10 = vmul.f32 1.442695, %v1747_v9 }
 0x74a   : > { %3653 = vpow2.f32 %v1752_v10 }
 0x753   : > { %v3652_v11 = vpop.eup %3651 }
 0x754   : > { %v1758_v12 = vsel %vm1239_vm2, %v3652_v11, 0.0 }
 0x755   : > { %1759 = vadd.xlane.f32.xlu0 %v1758_v12 }
 0x757   : > { %v3654_v13 = vpop.eup %3653 }
 0x758   : > { %v1761_v14 = vsel %vm1239_vm2, %v3654_v13, 0.0 }
 0x759   : > { %1762 = vadd.xlane.f32.xlu1 %v1761_v14 }
 0x76a   : > { %1827 = vrot.lane.b32.xlu1 %v4502_v48, %s4021_s3 }
 0x76e   : > { %1876 = vrot.lane.b32.xlu1 %v4454_v41, %s4022_s29 }
 0x773   : > { %v1742_v16 = vpop.xlane.xlu0 %1741 }
 0x774   : > { %v1748_v18 = vsub.f32 %v1732_v61, %v1742_v16 }
 0x776   : > { %v1754_v19 = vmul.f32 1.442695, %v1748_v18 }
 0x777   : > { %v1745_v20 = vpop.xlane.xlu0 %1744 }
 0x778   : > { %3655 = vpow2.f32 %v1754_v19  ;;  %v1749_v21 = vsub.f32 %v1733_v1, %v1745_v20 }
 0x77a   : > { %v1756_v22 = vmul.f32 1.442695, %v1749_v21 }
 0x77c   : > { %3657 = vpow2.f32 %v1756_v22 }
 0x785   : > { %v3656_v23 = vpop.eup %3655 }
 0x786   : > { %v1764_v24 = vsel %vm1239_vm2, %v3656_v23, 0.0 }
 0x787   : > { %1765 = vadd.xlane.f32.xlu0 %v1764_v24 }
 0x789   : > { %v3658_v25 = vpop.eup %3657 }
 0x78a   : > { %v1767_v26 = vsel %vm1239_vm2, %v3658_v25, 0.0 }
 0x792   : > { %1768 = vadd.xlane.f32.xlu1 %v1767_v26 }
 0x79d   : > { %1780 = vrot.lane.b32.xlu0 %v4504_v50, %s4021_s3 }
 0x7a1   : > { %1874 = vrot.lane.b32.xlu0 %v4462_v51, %s4022_s29 }
 0x7a3   : > { %1927 = vrot.lane.b32.xlu1 %v4464_v52, %s4022_s29 }
 0x7a7   : > { %1925 = vrot.lane.b32.xlu1 %v4473_v56, %s4022_s29 }
 0x7de   : > { %v1760_v34 = vpop.xlane.xlu0 %1759 }
 0x7e2   : > { %v1763_v41 = vpop.xlane.xlu1 %1762 }
 0x7e3   : > { %3659 = vrcp.f32 %v1763_v41 }
 0x7e4   : > { %3661 = vrcp.f32 %v1760_v34 }
 0x7e6   : > { %v1828_v31 = vpop.permute.xlu1 %1827 }
 0x7e7   : > { %3313 = vmatpush3.bf16.msra.mxu0 %v1828_v31 }
 0x7e8   : > { %3324 = vmatprep.subr.bf16.mxu0 %v4018_v27 }
 0x7ea   : > { %v1877_v45 = vpop.permute.xlu1 %1876 }
 0x7eb   : > { %v1882_v56 = vsel %vm1140_vm1, %v1877_v45, 0 }
 0x7f0   : > { %v3660_v35 = vpop.eup %3659 }
 0x7f1   : > { %v3662_v42 = vpop.eup %3661  ;;  %v1775_v43 = vmul.f32 %v3660_v35, %v3654_v13 }
 0x7f2   : > { %v1774_v51 = vmul.f32 %v3662_v42, %v3652_v11 }
 0x7f4   : > { %v1778_v52 = vpack.c.bf16 %v1775_v43, %v1774_v51 }
 0x810   : > { %v1766_v38 = vpop.xlane.xlu0 %1765 }
 0x811   : > { %3663 = vrcp.f32 %v1766_v38 }
 0x814   : > { %v1781_v44 = vpop.permute.xlu0 %1780 }
 0x815   : > { %3307 = vmatpush3.bf16.msra.mxu1 %v1781_v44 }
 0x816   : > { %3318 = vmatprep.subr.bf16.mxu1 %v4018_v27 }
 0x818   : > { %3309 = vmatmul.mubr.msk.bf16.vlgmr.msra.gmra.mxu1 %vm1239_vm2, %v1778_v52  ;;  %v1875_v47 = vpop.permute.xlu0 %1874 }
 0x819   : > { %3319 = vmatpush3.bf16.xpose.msra.mxu1 %v1882_v56  ;;  %3320 = vmatprep.mubr.msk.bf16.mxu1 %vm4019_vm0, %v4018_v27 }
 0x81a   : > { %3330 = vmatprep.subr.bf16.mxu1 %v4018_v27 }
 0x81b   : > { %v1769_v46 = vpop.xlane.xlu1 %1768 }
 0x81c   : > { %3665 = vrcp.f32 %v1769_v46 }
 0x81e   : > { %v3664_v49 = vpop.eup %3663 }
 0x81f   : > { %v1776_v53 = vmul.f32 %v3664_v49, %v3656_v23  ;;  %v1928_v59 = vpop.permute.xlu1 %1927 }
 0x820   : > { %3321 = vmatmul.mubr.msk.bf16.vlgmr.msra.gmra.mxu1 %vm1140_vm1, %v1875_v47  ;;  %v1933_v61 = vsel %vm1140_vm1, %v1928_v59, 0 }
 0x821   : > { %3332 = vmatprep.mubr.msk.bf16.mxu1 %vm4019_vm0, %v4018_v27 }
 0x823   : > { %v1926_v62 = vpop.permute.xlu1 %1925 }
 0x829   : > { %v3666_v32 = vpop.eup %3665 }
 0x82a   : > { %v1777_v55 = vmul.f32 %v3666_v32, %v3658_v25 }
 0x82c   : > { %v1779_v60 = vpack.c.bf16 %v1777_v55, %v1776_v53 }
 0x82e   : > { %3315 = vmatmul.mubr.msk.bf16.vlgmr.msra.gmra.mxu0 %vm1239_vm2, %v1779_v60 }
 0x82f   : > { %3325 = vmatpush3.bf16.xpose.msra.mxu0 %v1933_v61  ;;  %3326 = vmatprep.mubr.msk.bf16.mxu0 %vm4019_vm0, %v4018_v27 }
 0x830   : > { %3336 = vmatprep.subr.bf16.mxu0 %v4018_v27 }
 0x836   : > { %3327 = vmatmul.mubr.msk.bf16.vlgmr.msra.gmra.mxu0 %vm1140_vm1, %v1926_v62 }
 0x837   : > { %3338 = vmatprep.mubr.msk.bf16.mxu0 %vm4019_vm0, %v4018_v27 }
 0x8d8   : > { %v1820_v63 = vpop.f32.mrf.mxu1 }
 0x8da   : > { %v3310_v0 = vpop.f32.mrf.mxu1 }
 0x8dc   : > { %v1823_v1 = vpop.f32.mrf.mxu1 }
 0x8dd   : > { %v3519_v2 = vpack.i.bf16 %v1823_v1, %v1820_v63 }
 0x8de   : > { %v3311_v3 = vpop.f32.mrf.mxu1 }
 0x8e0   : > { %v1918_v4 = vpop.f32.mrf.mxu1 }
 0x8e1   : > { %v1976_v5 = vmul.f32 0.17677669, %v1918_v4 }
 0x8e2   : > { %v3322_v7 = vpop.f32.mrf.mxu1 }
 0x8e3   : > { %v1980_v8 = vsel %vm1239_vm2, %v1976_v5, -inf  ;;  %v3572_v7 = vld [vmem:[%s4363_s19 + $0x30] sm:$0xff]  }
 0x8e4   : > { %1981 = vmax.xlane.f32.xlu0 %v1980_v8  ;;  %v1921_v9 = vpop.f32.mrf.mxu1  ;;  %v3573_v8 = vld [vmem:[%s4363_s19 + $0x28] sm:$0xff]  }
 0x8e5   : > { %v1977_v10 = vmul.f32 0.17677669, %v1921_v9  ;;  %v3574_v9 = vld [vmem:[%s4363_s19 + $0x20] sm:$0xff]  }
 0x8e6   : > { %v3323_v11 = vpop.f32.mrf.mxu1 }
 0x8e7   : > { %v1983_v12 = vsel %vm1239_vm2, %v1977_v10, -inf  ;;  %v3576_v11 = vld [vmem:[%s4363_s19 + $0x10] sm:$0xff]  }
 0x8e8   : > { %1984 = vmax.xlane.f32.xlu1 %v1983_v12 }
 0x8ee   : > { %v1867_v13 = vpop.f32.mrf.mxu0 }
 0x8f0   : > { %v3316_v14 = vpop.f32.mrf.mxu0 }
 0x8f2   : > { %v1870_v27 = vpop.f32.mrf.mxu0 }
 0x8f3   : > { %v3524_v16 = vpack.i.bf16 %v1870_v27, %v1867_v13  ;;  %v3577_v13 = vld [vmem:[%s4363_s19 + $0x8] sm:$0xff]  }
 0x8f4   : > { %v3317_v18 = vpop.f32.mrf.mxu0 }
 0x8f6   : > { %v1969_v19 = vpop.f32.mrf.mxu0 }
 0x8f7   : > { %v1978_v20 = vmul.f32 0.17677669, %v1969_v19  ;;  %v3578_v19 = vld [vmem:[%s4363_s19] sm:$0xff]  }
 0x8f8   : > { %v3328_v21 = vpop.f32.mrf.mxu0 }
 0x8f9   : > { %v1986_v22 = vsel %vm1239_vm2, %v1978_v20, -inf }
 0x8fa   : > { %1987 = vmax.xlane.f32.xlu0 %v1986_v22  ;;  %v1972_v23 = vpop.f32.mrf.mxu0 }
 0x8fb   : > { %v1979_v24 = vmul.f32 0.17677669, %v1972_v23 }
 0x8fc   : > { %v3329_v25 = vpop.f32.mrf.mxu0 }
 0x8fd   : > { %v1989_v26 = vsel %vm1239_vm2, %v1979_v24, -inf }
 0x8fe   : > { %1990 = vmax.xlane.f32.xlu0 %v1989_v26 }
 0x96d   : > { %v1982_v41 = vpop.xlane.xlu0 %1981 }
 0x96e   : > { %v1992_v31 = vsub.f32 %v1976_v5, %v1982_v41  ;;  %v3571_v5 = vld [vmem:[%s4363_s19 + $0x38] sm:$0xff]  }
 0x970   : > { %v1996_v34 = vmul.f32 1.442695, %v1992_v31 }
 0x971   : > { %v1985_v35 = vpop.xlane.xlu1 %1984 }
 0x972   : > { %3667 = vpow2.f32 %v1996_v34  ;;  %v1993_v38 = vsub.f32 %v1977_v10, %v1985_v35  ;;  %v3575_v10 = vld [vmem:[%s4363_s19 + $0x18] sm:$0xff]  }
 0x974   : > { %v1998_v42 = vmul.f32 1.442695, %v1993_v38 }
 0x976   : > { %3669 = vpow2.f32 %v1998_v42 }
 0x97f   : > { %v3668_v43 = vpop.eup %3667 }
 0x980   : > { %v2004_v44 = vsel %vm1239_vm2, %v3668_v43, 0.0 }
 0x981   : > { %2005 = vadd.xlane.f32.xlu0 %v2004_v44 }
 0x983   : > { %v3670_v51 = vpop.eup %3669  ;;  %v1988_v45 = vpop.xlane.xlu0 %1987 }
 0x984   : > { %v1994_v52 = vsub.f32 %v1978_v20, %v1988_v45  ;;  %v2007_v56 = vsel %vm1239_vm2, %v3670_v51, 0.0 }
 0x985   : > { %2008 = vadd.xlane.f32.xlu1 %v2007_v56 }
 0x986   : > { %v2000_v46 = vmul.f32 1.442695, %v1994_v52 }
 0x987   : > { %v1991_v47 = vpop.xlane.xlu0 %1990 }
 0x988   : > { %3671 = vpow2.f32 %v2000_v46  ;;  %v1995_v49 = vsub.f32 %v1979_v24, %v1991_v47 }
 0x98a   : > { %v2002_v32 = vmul.f32 1.442695, %v1995_v49 }
 0x98c   : > { %3673 = vpow2.f32 %v2002_v32 }
 0x995   : > { %v3672_v53 = vpop.eup %3671 }
 0x996   : > { %v2010_v55 = vsel %vm1239_vm2, %v3672_v53, 0.0 }
 0x997   : > { %2011 = vadd.xlane.f32.xlu0 %v2010_v55 }
 0x999   : > { %v3674_v59 = vpop.eup %3673 }
 0x99a   : > { %v2013_v60 = vsel %vm1239_vm2, %v3674_v59, 0.0 }
 0x99b   : > { %2014 = vadd.xlane.f32.xlu1 %v2013_v60 }
 0x9ac   : > { %2073 = vrot.lane.b32.xlu1 %v4502_v48, %s4022_s29 }
 0x9ad   : > { %2026 = vrot.lane.b32.xlu0 %v4504_v50, %s4022_s29 }
 0x9b0   : > { %3510 = vrot.lane.b32.xlu1 %v3509_v40, %s4022_s29 }
 0x9b1   : > { %3520 = vrot.lane.b32.xlu0 %v3519_v2, %s4021_s3 }
 0x9b4   : > { %3515 = vrot.lane.b32.xlu1 %v3514_v58, %s4022_s29 }
 0x9b8   : > { %3525 = vrot.lane.b32.xlu1 %v3524_v16, %s4021_s3 }
 0xa0a   : > { %v2006_v62 = vpop.xlane.xlu0 %2005 }
 0xa0e   : > { %v2009_v61 = vpop.xlane.xlu1 %2008 }
 0xa0f   : > { %3675 = vrcp.f32 %v2009_v61 }
 0xa10   : > { %3677 = vrcp.f32 %v2006_v62 }
 0xa1c   : > { %v3676_v48 = vpop.eup %3675 }
 0xa1d   : > { %v3678_v63 = vpop.eup %3677  ;;  %v2021_v0 = vmul.f32 %v3676_v48, %v3670_v51 }
 0xa1e   : > { %v2020_v40 = vmul.f32 %v3678_v63, %v3668_v43 }
 0xa20   : > { %v2012_v50 = vpop.xlane.xlu0 %2011  ;;  %v2024_v54 = vpack.c.bf16 %v2021_v0, %v2020_v40 }
 0xa21   : > { %3679 = vrcp.f32 %v2012_v50 }
 0xa24   : > { %v2015_v36 = vpop.xlane.xlu1 %2014  ;;  %v2027_v39 = vpop.permute.xlu0 %2026 }
 0xa25   : > { %3681 = vrcp.f32 %v2015_v36  ;;  %3331 = vmatpush3.bf16.msra.mxu1 %v2027_v39 }
 0xa26   : > { %3342 = vmatprep.subr.bf16.mxu1 %v3571_v5 }
 0xa28   : > { %v2074_v57 = vpop.permute.xlu1 %2073  ;;  %3333 = vmatmul.mubr.msk.bf16.vlgmr.msra.gmra.mxu1 %vm1239_vm2, %v2024_v54  ;;  %v3521_v31 = vpop.permute.xlu0 %3520 }
 0xa29   : > { %3337 = vmatpush3.bf16.msra.mxu0 %v2074_v57  ;;  %3343 = vmatpush3.bf16.msra.mxu1 %v3571_v5  ;;  %v3523_v38 = vunpack.i.h.bf16 %v3521_v31  ;;  %v3522_v42 = vunpack.i.l.bf16 %v3521_v31 }
 0xa2a   : > { %3344 = vmatprep.subr.bf16.mxu1 %v3572_v7 }
 0xa2c   : > { %v3511_v25 = vpop.permute.xlu1 %3510 }
 0xa2d   : > { %3345 = vmatpush3.bf16.msra.mxu1 %v3572_v7  ;;  %v3513_v26 = vunpack.i.h.bf16 %v3511_v25  ;;  %v3512_v41 = vunpack.i.l.bf16 %v3511_v25  ;;  %v3700_v7 = vld [vmem:[#allocation2] sm:$0xff] }
 0xa2e   : > { %v3680_v58 = vpop.eup %3679  ;;  %3346 = vmatprep.subr.bf16.mxu1 %v3573_v8 }
 0xa2f   : > { %v2022_v2 = vmul.f32 %v3680_v58, %v3672_v53  ;;  %v2169_v34 = vsel %vm1140_vm1, %v4535_v17, %v3513_v26  ;;  %v2168_v35 = vsel %vm1140_vm1, %v4533_v15, %v3512_v41 }
 0xa30   : > { %v2173_v45 = vsel %vm2172_vm3, %v2168_v35, %v3522_v42  ;;  %v2174_v52 = vsel %vm2172_vm3, %v2169_v34, %v3523_v38  ;;  %v3516_v47 = vpop.permute.xlu1 %3515  ;;  %v3584_v42 = vld [vmem:[%s4369_s24 + $0x64] ss:$8 sps:$4 sm:$0xff]  }
 0xa31   : > { %3347 = vmatpush3.bf16.msra.mxu1 %v3573_v8  ;;  %v3518_v15 = vunpack.i.h.bf16 %v3516_v47  ;;  %v3517_v32 = vunpack.i.l.bf16 %v3516_v47  ;;  %v3596_v47 = vld [vmem:[%s4369_s24 + $0x24] ss:$8 sps:$4 sm:$0xff]  }
 0xa32   : > { %v3682_v1 = vpop.eup %3681  ;;  %3348 = vmatprep.subr.bf16.mxu1 %v3574_v9 }
 0xa33   : > { %v2023_v3 = vmul.f32 %v3682_v1, %v3674_v59  ;;  %v2171_v60 = vsel %vm1140_vm1, %v4541_v33, %v3518_v15  ;;  %v2170_v61 = vsel %vm1140_vm1, %v4539_v28, %v3517_v32  ;;  %v3086_v33 = vld [vmem:[%s4959_s22] ss:$0 sm:$0xff]  ;;  %v3699_v1 = vld [vmem:[#allocation2 + $0x10] sm:$0xff] }
 0xa34   : > { %v3526_v49 = vpop.permute.xlu1 %3525  ;;  %v3597_v15 = vld [vmem:[%s4369_s24 + $0x10] ss:$8 sps:$4 sm:$0xff]   ;;  %v3602_v32 = vld [vmem:[%s4369_s24 + $0x4] ss:$8 sps:$4 sm:$0xff]  }
 0xa35   : > { %v2025_v4 = vpack.c.bf16 %v2023_v3, %v2022_v2  ;;  %3349 = vmatpush3.bf16.msra.mxu1 %v3574_v9  ;;  %v3528_v53 = vunpack.i.h.bf16 %v3526_v49  ;;  %v3527_v55 = vunpack.i.l.bf16 %v3526_v49  ;;  %v3701_v9 = vld [vmem:[#allocation2 + $0x18] sm:$0xff] }
 0xa36   : > { %3350 = vmatprep.subr.bf16.mxu1 %v3575_v10  ;;  %v3599_v49 = vld [vmem:[%s4369_s24 + $0x14] ss:$8 sps:$4 sm:$0xff]  }
 0xa37   : > { %3339 = vmatmul.mubr.msk.bf16.vlgmr.msra.gmra.mxu0 %vm1239_vm2, %v2025_v4  ;;  %v2175_v50 = vsel %vm2172_vm3, %v2170_v61, %v3527_v55  ;;  %v2176_v63 = vsel %vm2172_vm3, %v2171_v60, %v3528_v53  ;;  %v3600_v53 = vld [vmem:[%s4369_s24] ss:$8 sps:$4 sm:$0xff]   ;;  %v3603_v55 = vld [vmem:[%s4371_s13 + $0x78] sm:$0xff]   ;;  %v3605_v60 = vld [vmem:[%s4371_s13 + $0x70] sm:$0xff]  }
 0xa38   : > { %2481 = vmatprep.mubr.bf16.mxu0 %v4017_v6  ;;  %v3606_v61 = vld [vmem:[%s4371_s13 + $0x30] sm:$0xff]  }
 0xa39   : > { %3351 = vmatpush3.bf16.msra.mxu1 %v3575_v10 }
 0xa3a   : > { %3352 = vmatprep.subr.bf16.mxu1 %v3576_v11 }
 0xa3d   : > { %3353 = vmatpush3.bf16.msra.mxu1 %v3576_v11  ;;  %v3702_v11 = vld [vmem:[#allocation2 + $0x8] sm:$0xff] }
 0xa3e   : > { %3354 = vmatprep.subr.bf16.mxu1 %v3577_v13 }
 0xa41   : > { %3355 = vmatpush3.bf16.msra.mxu1 %v3577_v13  ;;  %v3579_v13 = vld [vmem:[%s4369_s24 + $0x70] ss:$8 sps:$4 sm:$0xff]  }
 0xa42   : > { %3356 = vmatprep.subr.bf16.mxu1 %v3578_v19 }
 0xa45   : > { %3357 = vmatpush3.bf16.msra.mxu1 %v3578_v19 }
 0xa46   : > { %3198 = vmatprep.subr.bf16.mxu1 %v3603_v55 }
 0xae8   : > { %v2066_v12 = vpop.f32.mrf.mxu1 }
 0xaea   : > { %v3334_v14 = vpop.f32.mrf.mxu1 }
 0xaeb   : > { %v3581_v14 = vld [vmem:[%s4369_s24 + $0x74] ss:$8 sps:$4 sm:$0xff]  }
 0xaec   : > { %v2069_v27 = vpop.f32.mrf.mxu1  ;;  %2449 = vmatprep.subr.bf16.mxu0 %v3581_v14  ;;  %v3096_v14 = vld [vmem:[%s759_s16] ss:$0 sm:$0xff]  ;;  %s4962_s16 = sld [smem:[#allocation36_spill]] }
 0xaed   : > { %v3529_v16 = vpack.i.bf16 %v2069_v27, %v2066_v12  ;;  %2450 = vmatpush1.bf16.msra.mxu0 %v3579_v13 }
 0xaee   : > { %v3335_v18 = vpop.f32.mrf.mxu1  ;;  %2451 = vmatprep.subr.bf16.mxu0 %v3584_v42  ;;  %v3617_v42 = vld [vmem:[%s4371_s13 + $0x40] sm:$0xff]  }
 0xaef   : > { %3530 = vrot.lane.b32.xlu0 %v3529_v16, %s4020_s2 }
 0xaf7   : > { %v2113_v20 = vpop.f32.mrf.mxu0 }
 0xaf9   : > { %v3340_v21 = vpop.f32.mrf.mxu0 }
 0xafb   : > { %v2116_v22 = vpop.f32.mrf.mxu0 }
 0xafc   : > { %v3534_v23 = vpack.i.bf16 %v2116_v22, %v2113_v20 }
 0xafd   : > { %v3341_v24 = vpop.f32.mrf.mxu0 }
 0xafe   : > { %3535 = vrot.lane.b32.xlu1 %v3534_v23, %s4020_s2 }
 0xb61   : > { %v3531_v43 = vpop.permute.xlu0 %3530 }
 0xb62   : > { %v3533_v44 = vunpack.i.h.bf16 %v3531_v43  ;;  %v3532_v51 = vunpack.i.l.bf16 %v3531_v43  ;;  %v3582_v43 = vld [vmem:[%s4369_s24 + $0x60] ss:$8 sps:$4 sm:$0xff]  }
 0xb63   : > { %2452 = vmatpush1.bf16.msra.mxu0 %v3582_v43  ;;  %v3618_v43 = vld [vmem:[%s4371_s13] sm:$0xff]  }
 0xb64   : > { %v2178_v56 = vsel %vm2177_vm4, %v2173_v45, %v3532_v51  ;;  %v2179_v46 = vsel %vm2177_vm4, %v2174_v52, %v3533_v44  ;;  %v3587_v44 = vld [vmem:[%s4369_s24 + $0x54] ss:$8 sps:$4 sm:$0xff]   ;;  %v3585_v51 = vld [vmem:[%s4369_s24 + $0x50] ss:$8 sps:$4 sm:$0xff]   ;;  %v3590_v45 = vld [vmem:[%s4369_s24 + $0x44] ss:$8 sps:$4 sm:$0xff]  }
 0xb65   : > { %v2182_v17 = vpack.c.bf16 %v2179_v46, %v2178_v56  ;;  %2453 = vmatprep.subr.bf16.mxu0 %v3587_v44  ;;  %v3588_v52 = vld [vmem:[%s4369_s24 + $0x40] ss:$8 sps:$4 sm:$0xff]   ;;  %v3591_v56 = vld [vmem:[%s4369_s24 + $0x30] ss:$8 sps:$4 sm:$0xff]   ;;  %v3593_v46 = vld [vmem:[%s4369_s24 + $0x34] ss:$8 sps:$4 sm:$0xff]  }
 0xb67   : > { %3358 = vmatprep.mubr.bf16.mxu1 %v2182_v17  ;;  %2454 = vmatpush1.bf16.msra.mxu0 %v3585_v51  ;;  %v3594_v17 = vld [vmem:[%s4369_s24 + $0x20] ss:$8 sps:$4 sm:$0xff]  }
 0xb68   : > { %2455 = vmatprep.subr.bf16.mxu0 %v3590_v45 }
 0xb6b   : > { %2456 = vmatpush1.bf16.msra.mxu0 %v3588_v52 }
 0xb6c   : > { %2457 = vmatprep.subr.bf16.mxu0 %v3593_v46 }
 0xb6f   : > { %2458 = vmatpush1.bf16.msra.mxu0 %v3591_v56 }
 0xb70   : > { %v3536_v59 = vpop.permute.xlu1 %3535  ;;  %2459 = vmatprep.subr.bf16.mxu0 %v3596_v47 }
 0xb71   : > { %v3538_v62 = vunpack.i.h.bf16 %v3536_v59  ;;  %v3537_v48 = vunpack.i.l.bf16 %v3536_v59  ;;  %v3604_v59 = vld [vmem:[%s4371_s13 + $0x38] sm:$0xff]  }
 0xb73   : > { %v2181_v0 = vsel %vm2177_vm4, %v2176_v63, %v3538_v62  ;;  %v2180_v36 = vsel %vm2177_vm4, %v2175_v50, %v3537_v48  ;;  %2460 = vmatpush1.bf16.msra.mxu0 %v3594_v17  ;;  %v3607_v62 = vld [vmem:[%s4371_s13 + $0x68] sm:$0xff]   ;;  %v3609_v50 = vld [vmem:[%s4371_s13 + $0x60] sm:$0xff]  }
 0xb74   : > { %v2183_v39 = vpack.c.bf16 %v2181_v0, %v2180_v36  ;;  %2461 = vmatprep.subr.bf16.mxu0 %v3599_v49  ;;  %v3608_v48 = vld [vmem:[%s4371_s13 + $0x28] sm:$0xff]   ;;  %v3610_v63 = vld [vmem:[%s4371_s13 + $0x20] sm:$0xff]   ;;  %v3611_v0 = vld [vmem:[%s4371_s13 + $0x58] sm:$0xff]  }
 0xb75   : > { %v3612_v36 = vld [vmem:[%s4371_s13 + $0x18] sm:$0xff]  }
 0xb76   : > { %3359 = vmatmul.mubr.bf16.vlgmr.msra.gmra.mxu1 %v2183_v39 }
 0xb77   : > { %2462 = vmatpush1.bf16.msra.mxu0 %v3597_v15  ;;  %3199 = vmatpush3.bf16.msra.mxu1 %v3604_v59 }
 0xb78   : > { %2463 = vmatprep.subr.bf16.mxu0 %v3602_v32  ;;  %3200 = vmatprep.subr.bf16.mxu1 %v3605_v60 }
 0xb7b   : > { %2464 = vmatpush1.bf16.msra.mxu0 %v3600_v53  ;;  %3201 = vmatpush3.bf16.msra.mxu1 %v3606_v61 }
 0xb7c   : > { %3202 = vmatprep.subr.bf16.mxu1 %v3607_v62 }
 0xb7f   : > { %3203 = vmatpush3.bf16.msra.mxu1 %v3608_v48 }
 0xb80   : > { %3204 = vmatprep.subr.bf16.mxu1 %v3609_v50 }
 0xb83   : > { %3205 = vmatpush3.bf16.msra.mxu1 %v3610_v63 }
 0xb84   : > { %3206 = vmatprep.subr.bf16.mxu1 %v3611_v0 }
 0xb87   : > { %3207 = vmatpush3.bf16.msra.mxu1 %v3612_v36 }
 0xc36   : > { %v3360_v40 = vpop.f32.mrf.mxu1 }
 0xc37   : > { %v2281_v58 = vadd.f32 %v3360_v40, %v3086_v33 }
 0xc38   : > { %v2272_v54 = vpop.f32.mrf.mxu1 }
 0xc39   : > { %v2273_v28 = vadd.f32 %v3086_v33, %v2272_v54  ;;  %v2289_v10 = vadd.f32 %v3701_v9, %v2281_v58  ;;  %v3095_v9 = vld [vmem:[%s756_s17] ss:$0 sm:$0xff] }
 0xc3a   : > { %v3361_v57 = vpop.f32.mrf.mxu1 }
 0xc3b   : > { %v2287_v2 = vadd.f32 %v3699_v1, %v2273_v28  ;;  %v2284_v5 = vadd.f32 %v3361_v57, %v3086_v33 }
 0xc3c   : > { %v2275_v3 = vpop.f32.mrf.mxu1 }
 0xc3d   : > { %v2276_v4 = vadd.f32 %v3086_v33, %v2275_v3  ;;  %2291 = vadd.xlane.f32.xlu0 %v2287_v2  ;;  %v2290_v12 = vadd.f32 %v3702_v11, %v2284_v5 }
 0xc3f   : > { %v2288_v8 = vadd.f32 %v3700_v7, %v2276_v4 }
 0xc41   : > { %2293 = vadd.xlane.f32.xlu1 %v2288_v8  ;;  %2295 = vadd.xlane.f32.xlu0 %v2289_v10 }
 0xc45   : > { %2297 = vadd.xlane.f32.xlu0 %v2290_v12 }
 0xcc6   : > { %v2292_v27 = vpop.xlane.xlu0 %2291 }
 0xcc7   : > { %v2300_v16 = vmul.f32 0.0078125, %v2292_v27 }
 0xcc9   : > { %v4687_v18 = vsub.f32 %v2287_v2, %v2300_v16 }
 0xcca   : > { %v2294_v19 = vpop.xlane.xlu1 %2293  ;;  %v2296_v20 = vpop.xlane.xlu0 %2295 }
 0xccb   : > { %v2301_v21 = vmul.f32 0.0078125, %v2294_v19  ;;  %v2302_v22 = vmul.f32 0.0078125, %v2296_v20  ;;  %v2308_v23 = vmul.f32 %v4687_v18, %v4687_v18 }
 0xccd   : > { %v4691_v24 = vsub.f32 %v2288_v8, %v2301_v21  ;;  %v4693_v25 = vsub.f32 %v2289_v10, %v2302_v22  ;;  %2312 = vadd.xlane.f32.xlu0 %v2308_v23 }
 0xcce   : > { %v2298_v26 = vpop.xlane.xlu0 %2297 }
 0xccf   : > { %v2303_v41 = vmul.f32 0.0078125, %v2298_v26  ;;  %v2309_v31 = vmul.f32 %v4691_v24, %v4691_v24  ;;  %v2310_v34 = vmul.f32 %v4693_v25, %v4693_v25 }
 0xcd1   : > { %v4699_v35 = vsub.f32 %v2290_v12, %v2303_v41  ;;  %2314 = vadd.xlane.f32.xlu1 %v2309_v31  ;;  %2316 = vadd.xlane.f32.xlu0 %v2310_v34  ;;  %v3613_v31 = vld [vmem:[%s4371_s13 + $0x50] sm:$0xff]  }
 0xcd2   : > { %v3614_v34 = vld [vmem:[%s4371_s13 + $0x10] sm:$0xff]   ;;  %3208 = vmatprep.subr.bf16.mxu1 %v3613_v31 }
 0xcd3   : > { %v2311_v38 = vmul.f32 %v4699_v35, %v4699_v35  ;;  %3209 = vmatpush3.bf16.msra.mxu1 %v3614_v34 }
 0xcd5   : > { %2318 = vadd.xlane.f32.xlu1 %v2311_v38  ;;  %v3616_v38 = vld [vmem:[%s4371_s13 + $0x8] sm:$0xff]  }
 0xd56   : > { %v2313_v39 = vpop.xlane.xlu0 %2312 }
 0xd57   : > { %v2320_v40 = vmul.f32 0.0078125, %v2313_v39 }
 0xd59   : > { %v2324_v33 = vadd.f32 1e-05, %v2320_v40 }
 0xd5a   : > { %v2315_v54 = vpop.xlane.xlu1 %2314  ;;  %v2317_v28 = vpop.xlane.xlu0 %2316 }
 0xd5b   : > { %3683 = vrsqrt.f32 %v2324_v33  ;;  %v2321_v57 = vmul.f32 0.0078125, %v2315_v54  ;;  %v2322_v58 = vmul.f32 0.0078125, %v2317_v28 }
 0xd5d   : > { %v2325_v1 = vadd.f32 1e-05, %v2321_v57  ;;  %v2326_v2 = vadd.f32 1e-05, %v2322_v58  ;;  %v3113_v58 = vld [vmem:[%s753_s10] ss:$0 sm:$0xff] }
 0xd5e   : > { %v2319_v3 = vpop.xlane.xlu1 %2318 }
 0xd5f   : > { %3685 = vrsqrt.f32 %v2325_v1  ;;  %v2323_v4 = vmul.f32 0.0078125, %v2319_v3 }
 0xd60   : > { %3687 = vrsqrt.f32 %v2326_v2 }
 0xd61   : > { %v2327_v5 = vadd.f32 1e-05, %v2323_v4 }
 0xd63   : > { %3689 = vrsqrt.f32 %v2327_v5 }
 0xd68   : > { %v3684_v7 = vpop.eup %3683 }
 0xd69   : > { %v2332_v8 = vmul.f32 %v3684_v7, %v4687_v18 }
 0xd6b   : > { %v2342_v12 = vmul.f32 %v3095_v9, %v2332_v8 }
 0xd6c   : > { %v3686_v10 = vpop.eup %3685 }
 0xd6d   : > { %v2333_v11 = vmul.f32 %v3686_v10, %v4691_v24  ;;  %v3688_v13 = vpop.eup %3687  ;;  %v4739_v18 = vadd.f32 %v3096_v14, %v2342_v12 }
 0xd6e   : > { %v2334_v20 = vmul.f32 %v3688_v13, %v4693_v25 }
 0xd6f   : > { %v2343_v27 = vmul.f32 %v3095_v9, %v2333_v11 }
 0xd70   : > { %v3690_v16 = vpop.eup %3689  ;;  %v2344_v24 = vmul.f32 %v3095_v9, %v2334_v20 }
 0xd71   : > { %v4741_v19 = vadd.f32 %v3096_v14, %v2343_v27  ;;  %v2335_v21 = vmul.f32 %v3690_v16, %v4699_v35  ;;  %v3615_v35 = vld [vmem:[%s4371_s13 + $0x48] sm:$0xff]  }
 0xd72   : > { %v4750_v41 = vadd.f32 %v3096_v14, %v2344_v24  ;;  %3210 = vmatprep.subr.bf16.mxu1 %v3615_v35 }
 0xd73   : > { %v2356_v22 = vpack.c.bf16 %v4741_v19, %v4739_v18  ;;  %v2345_v23 = vmul.f32 %v3095_v9, %v2335_v21  ;;  %3211 = vmatpush3.bf16.msra.mxu1 %v3616_v38 }
 0xd74   : > { %3212 = vmatprep.subr.bf16.mxu1 %v3617_v42 }
 0xd75   : > { %2482 = vmatmul.mubr.bf16.vlgmr.msra.gmra.mxu0 %v2356_v22  ;;  %v4748_v26 = vadd.f32 %v3096_v14, %v2345_v23 }
 0xd76   : > { %2491 = vmatprep.mubr.bf16.mxu0 %v4017_v6  ;;  %v850_v6 = vld [vmem:[%s4962_s16] sm:$0x3] }
 0xd77   : > { %v2357_v25 = vpack.c.bf16 %v4748_v26, %v4750_v41  ;;  %3213 = vmatpush3.bf16.msra.mxu1 %v3618_v43  ;;  %v2366_v51 = vrot.slane %v850_v6, %v897_v30  ;;  %v2362_v45 = vrot.slane %v850_v6, %v893_v37 }
 0xd7d   : > { %2492 = vmatmul.mubr.bf16.gmra.mxu0 %v2357_v25 }
 0xe35   : > { %v2483_v44 = vpop.f32.mrf.mxu0 }
 0xe36   : > { %v2484_v17 = vadd.f32 %v2483_v44, %v2362_v45 }
 0xe37   : > { %v2485_v52 = vpop.f32.mrf.mxu0 }
 0xe38   : > { %v2486_v46 = vadd.f32 %v2485_v52, %v2366_v51  ;;  %v2502_v60 = vmax.f32 %v2484_v17, 0.0 }
 0xe39   : > { %v2487_v56 = vpop.f32.mrf.mxu0 }
 0xe3a   : > { %v2488_v47 = vadd.f32 %v2487_v56, %v2362_v45  ;;  %v2503_v55 = vmax.f32 %v2486_v46, 0.0 }
 0xe3b   : > { %v2489_v49 = vpop.f32.mrf.mxu0 }
 0xe3c   : > { %v2490_v15 = vadd.f32 %v2489_v49, %v2366_v51  ;;  %v2504_v32 = vmax.f32 %v2488_v47, 0.0 }
 0xe3d   : > { %v2493_v53 = vpop.f32.mrf.mxu0 }
 0xe3e   : > { %v2505_v59 = vmax.f32 %v2490_v15, 0.0  ;;  %v2510_v48 = vpack.c.bf16 %v2504_v32, %v2502_v60  ;;  %v2494_v37 = vadd.f32 %v2493_v53, %v2362_v45 }
 0xe3f   : > { %v2495_v61 = vpop.f32.mrf.mxu0 }
 0xe40   : > { %v2511_v62 = vpack.c.bf16 %v2505_v59, %v2503_v55  ;;  %v2496_v30 = vadd.f32 %v2495_v61, %v2366_v51  ;;  %v2506_v33 = vmax.f32 %v2494_v37, 0.0 }
 0xe41   : > { %v2497_v50 = vpop.f32.mrf.mxu0 }
 0xe42   : > { %v2498_v29 = vadd.f32 %v2497_v50, %v2362_v45  ;;  %2648 = vmatprep.mubr.bf16.mxu1 %v2511_v62  ;;  %v2507_v39 = vmax.f32 %v2496_v30, 0.0  ;;  %v3130_v62 = vld [vmem:[%s762_s26] ss:$0 sm:$0xff]  ;;  %s4966_s26 = sld [smem:[#allocation25_spill]] }
 0xe43   : > { %v2499_v63 = vpop.f32.mrf.mxu0  ;;  %2649 = vmatmul.mubr.bf16.vlgmr.msra.gmra.mxu1 %v2510_v48  ;;  %v3131_v50 = vld [vmem:[%s765_s4] ss:$0 sm:$0xff] }
 0xe44   : > { %v2500_v0 = vadd.f32 %v2499_v63, %v2366_v51  ;;  %v2508_v36 = vmax.f32 %v2498_v29, 0.0 }
 0xe46   : > { %v2509_v40 = vmax.f32 %v2500_v0, 0.0  ;;  %v2512_v28 = vpack.c.bf16 %v2508_v36, %v2506_v33 }
 0xe48   : > { %v2513_v54 = vpack.c.bf16 %v2509_v40, %v2507_v39  ;;  %p3132_p0 = scmp.ne.s32.totalorder %s4966_s26, 1 }
 0xe4a   : > { %2656 = vmatprep.mubr.bf16.mxu1 %v2513_v54 }
 0xe4b   : > { %2657 = vmatmul.mubr.bf16.gmra.mxu1 %v2512_v28 }
 0xf03   : > { %v3214_v57 = vpop.f32.mrf.mxu1 }
 0xf05   : > { %v3215_v1 = vpop.f32.mrf.mxu1 }
 0xf06   : > { %v3216_v2 = vadd.f32 %v3215_v1, %v3214_v57 }
 0xf07   : > { %v3217_v3 = vpop.f32.mrf.mxu1 }
 0xf08   : > { %v2651_v4 = vadd.f32 %v3216_v2, %v3113_v58 }
 0xf09   : > { %v3218_v5 = vpop.f32.mrf.mxu1 }
 0xf0a   : > { %v3219_v7 = vadd.f32 %v3218_v5, %v3217_v3  ;;  %v2665_v8 = vadd.f32 %v2651_v4, %v4739_v18 }
 0xf0b   : > { %v3220_v9 = vpop.f32.mrf.mxu1 }
 0xf0c   : > { %v2654_v10 = vadd.f32 %v3219_v7, %v3113_v58  ;;  %2669 = vadd.xlane.f32.xlu0 %v2665_v8 }
 0xf0d   : > { %v3221_v11 = vpop.f32.mrf.mxu1 }
 0xf0e   : > { %v3222_v12 = vadd.f32 %v3221_v11, %v3220_v9  ;;  %v2666_v13 = vadd.f32 %v2654_v10, %v4741_v19 }
 0xf0f   : > { %v3223_v14 = vpop.f32.mrf.mxu1 }
 0xf10   : > { %v2659_v27 = vadd.f32 %v3222_v12, %v3113_v58  ;;  %2671 = vadd.xlane.f32.xlu1 %v2666_v13 }
 0xf11   : > { %v3224_v16 = vpop.f32.mrf.mxu1 }
 0xf12   : > { %v3225_v20 = vadd.f32 %v3224_v16, %v3223_v14  ;;  %v2667_v21 = vadd.f32 %v2659_v27, %v4750_v41 }
 0xf14   : > { %v2662_v22 = vadd.f32 %v3225_v20, %v3113_v58  ;;  %2673 = vadd.xlane.f32.xlu0 %v2667_v21 }
 0xf16   : > { %v2668_v23 = vadd.f32 %v2662_v22, %v4748_v26 }
 0xf18   : > { %2675 = vadd.xlane.f32.xlu1 %v2668_v23 }
 0xf95   : > { %v2670_v18 = vpop.xlane.xlu0 %2669 }
 0xf96   : > { %v2677_v24 = vmul.f32 0.0078125, %v2670_v18 }
 0xf98   : > { %v2681_v25 = vsub.f32 %v2665_v8, %v2677_v24 }
 0xf99   : > { %v2672_v31 = vpop.xlane.xlu1 %2671 }
 0xf9a   : > { %v2678_v34 = vmul.f32 0.0078125, %v2672_v31  ;;  %v2685_v35 = vmul.f32 %v2681_v25, %v2681_v25 }
 0xf9c   : > { %v2682_v38 = vsub.f32 %v2666_v13, %v2678_v34  ;;  %2689 = vadd.xlane.f32.xlu0 %v2685_v35 }
 0xf9d   : > { %v2674_v19 = vpop.xlane.xlu0 %2673 }
 0xf9e   : > { %v2679_v42 = vmul.f32 0.0078125, %v2674_v19  ;;  %v2686_v43 = vmul.f32 %v2682_v38, %v2682_v38 }
 0xfa0   : > { %v2683_v6 = vsub.f32 %v2667_v21, %v2679_v42  ;;  %2691 = vadd.xlane.f32.xlu1 %v2686_v43 }
 0xfa1   : > { %v2676_v44 = vpop.xlane.xlu1 %2675 }
 0xfa2   : > { %v2680_v41 = vmul.f32 0.0078125, %v2676_v44  ;;  %v2687_v51 = vmul.f32 %v2683_v6, %v2683_v6 }
 0xfa4   : > { %v2684_v45 = vsub.f32 %v2668_v23, %v2680_v41  ;;  %2693 = vadd.xlane.f32.xlu0 %v2687_v51 }
 0xfa6   : > { %v2688_v26 = vmul.f32 %v2684_v45, %v2684_v45 }
 0xfa8   : > { %2695 = vadd.xlane.f32.xlu1 %v2688_v26 }
0x1025   : > { %v2690_v52 = vpop.xlane.xlu0 %2689 }
0x1026   : > { %v2697_v56 = vmul.f32 0.0078125, %v2690_v52 }
0x1028   : > { %v2701_v46 = vadd.f32 1e-05, %v2697_v56 }
0x1029   : > { %v2692_v47 = vpop.xlane.xlu1 %2691 }
0x102a   : > { %3691 = vrsqrt.f32 %v2701_v46  ;;  %v2698_v17 = vmul.f32 0.0078125, %v2692_v47 }
0x102c   : > { %v2702_v49 = vadd.f32 1e-05, %v2698_v17 }
0x102d   : > { %v2694_v15 = vpop.xlane.xlu0 %2693 }
0x102e   : > { %3693 = vrsqrt.f32 %v2702_v49  ;;  %v2699_v32 = vmul.f32 0.0078125, %v2694_v15 }
0x1030   : > { %v2703_v53 = vadd.f32 1e-05, %v2699_v32 }
0x1031   : > { %v2696_v55 = vpop.xlane.xlu1 %2695 }
0x1032   : > { %3695 = vrsqrt.f32 %v2703_v53  ;;  %v2700_v59 = vmul.f32 0.0078125, %v2696_v55 }
0x1034   : > { %v2704_v60 = vadd.f32 1e-05, %v2700_v59 }
0x1036   : > { %3697 = vrsqrt.f32 %v2704_v60 }
0x1037   : > { %v3692_v61 = vpop.eup %3691 }
0x1038   : > { %v2709_v48 = vmul.f32 %v3692_v61, %v2681_v25 }
0x103a   : > { %v2719_v30 = vmul.f32 %v3130_v62, %v2709_v48 }
0x103b   : > { %v3694_v29 = vpop.eup %3693 }
0x103c   : > { %v2729_v37 = vadd.f32 %v3131_v50, %v2719_v30  ;;  %v2710_v63 = vmul.f32 %v3694_v29, %v2682_v38 }
0x103e   : > { %2733 = vst [vmem:[#allocation2 + $0x10] sm:$0xff] %v2729_v37  ;;  %v2720_v0 = vmul.f32 %v3130_v62, %v2710_v63 }
0x103f   : > { %v3696_v36 = vpop.eup %3695 }
0x1040   : > { %v2730_v39 = vadd.f32 %v3131_v50, %v2720_v0  ;;  %v2711_v40 = vmul.f32 %v3696_v36, %v2683_v6 }
0x1042   : > { %2734 = vst [vmem:[#allocation2] sm:$0xff] %v2730_v39  ;;  %v2721_v33 = vmul.f32 %v3130_v62, %v2711_v40 }
0x1043   : > { %v3698_v54 = vpop.eup %3697 }
0x1044   : > { %v2731_v28 = vadd.f32 %v3131_v50, %v2721_v33  ;;  %v2712_v57 = vmul.f32 %v3698_v54, %v2684_v45 }
0x1046   : > { %2735 = vst [vmem:[#allocation2 + $0x18] sm:$0xff] %v2731_v28  ;;  %v2722_v58 = vmul.f32 %v3130_v62, %v2712_v57  ;;  %2740 = sbr.rel (%p3132_p0) target bundleno = 4173 (0x104d), region = 104 }
0x1048   : > { %v2732_v1 = vadd.f32 %v3131_v50, %v2722_v58 }
0x104a   : > { %2736 = vst [vmem:[#allocation2 + $0x8] sm:$0xff] %v2732_v1 }
0x104b   : > { %2741 = vst [vmem:[%s4413_s8] sm:$0xff] %v2729_v37  ;;  %2742 = vst [vmem:[%s4413_s8 + $0x8] sm:$0xff] %v2730_v39 }
0x104c   : > { %2743 = vst [vmem:[%s4413_s8 + $0x10] sm:$0xff] %v2731_v28  ;;  %2744 = vst [vmem:[%s4413_s8 + $0x18] sm:$0xff] %v2732_v1 }
0x104d PF: > { %s4967_s28 = sld [smem:[#allocation26_spill]]  ;;  %s2760_s29 = sshll.u32 %s4413_s8, 4  ;;  %s4796_s29 = int_to_ptr.vmem [resolvable:$true] %s2760_s29 }
0x104e   : > { %s4968_s1 = sld [smem:[#allocation34_spill]]  ;;  %s2746_s21 = scalar_lea.sflag [#allocation5], %s4341_s9 }
0x104f   : > { %s4969_s2 = sld [smem:[#allocation50_spill]]  ;;  %s3871_s5 = scalar_lea.vmem %s4796_s29, 512 }
0x1050   : > { %p3872_p12 = scmp.ne.s32.totalorder %s4796_s29, %s3871_s5  ;;  %s4023_s20 = smov [#allocation14]  }
0x1051   : > { %s3875_s22 = sshll.u32 %s4023_s20, 4  ;;  %s3876_s22 = int_to_ptr.vmem [resolvable:$false] %s3875_s22 }
0x1052   : > { %s3877_s19 = scalar_lea.vmem %s3876_s22, 1024  ;;  %p3878_p9 = scmp.lt.s32.totalorder %s4796_s29, %s3876_s22 }
0x1053   : > { %s3145_s7 = sshll.u32 %s4967_s28, 9  ;;  %p3879_p11 = scmp.lt.s32.totalorder %s3877_s19, %s3871_s5 }
0x1054   : > { %p4970_p2 = scmp.ne.s32.totalorder %s4968_s1, 0 }
0x1055   : > { %s4793_s3 = scalar_lea.hbm %s4969_s2, %s3145_s7  ;;  %p3880_p4 = por %p3879_p11, %p3878_p9 }
0x1056   : > { %p3873_p8 = pnand %p3872_p12, %p4970_p2 }
0x1058   : > { %p3874_p3 = pneg %p3873_p8 }
0x105a   : > { %p3881_p1 = pnand %p3880_p4, %p3874_p3 }
0x105c   : > { %3884 = shalt.err (!%p3881_p1)
}
0x105d   : > { %s3885_s8 = scalar_lea.hbm %s4793_s3, 512  ;;  %s3889_s0 = scalar_lea.hbm %s4969_s2, 1024 }
0x105e   : > { %p3886_p10 = scmp.ne.s32.totalorder %s4793_s3, %s3885_s8  ;;  %p3890_p5 = scmp.lt.s32.totalorder %s4793_s3, %s4969_s2 }
0x105f   : > { %p3891_p7 = scmp.lt.s32.totalorder %s3889_s0, %s3885_s8 }
0x1060   : > { %p3887_p13 = pnand %p3886_p10, %p4970_p2 }
0x1061   : > { %p3892_p0 = por %p3891_p7, %p3890_p5 }
0x1062   : > { %p3888_p6 = pneg %p3887_p13 }
0x1064   : > { %p3893_p12 = pnand %p3892_p0, %p3888_p6 }
0x1066   : > { %3896 = shalt.err (!%p3893_p12)
}
0x1067   : > { %s4024_s16 = smov 128   ;;  %s4025_s13 = smov 8  }
0x1068   : > { %3380 = dma.vmem_to_hbm [thread:$0]  (%p4970_p2), %s4796_s29, 512, %s4793_s3, %s2746_s21, %s4024_s16, %s4024_s16, %s4025_s13  }
0x1069 PF: > { %s4971_s11 = sld [smem:[#allocation29_spill]] }
0x106a   : > { %s4972_s15 = sld [smem:[#allocation22_spill]] }
0x106b   : > { %s4973_s10 = sld [smem:[#allocation35_spill]] }
0x106f   : > { %p3406_p8 = scmp.ge.s32.totalorder %s4971_s11, 2 }
0x1070   : > { %s2775_s14 = sand.u32 1, %s4972_s15  }
0x1071   : > { %p4974_p3 = scmp.ne.s32.totalorder %s4973_s10, 0  ;;  %s2776_s30 = scalar_lea.sflag [#allocation5], %s2775_s14 }
0x1073   : > { %p3402_p9 = pnand %p3406_p8, %p4974_p3 }
0x1075   : > { %p3403_p11 = pneg %p3402_p9 }
0x1077   : > { %3958 = dma.done.wait (%p3403_p11), %s2776_s30, 512  }
0x1078   : > { %3960 = vsyncadd (%p3403_p11), %s2776_s30, 4294966784  ;;  %s38_s18 = sadd.s32 1, %s4971_s11   ;;  %s4975_s25 = sld [smem:[#allocation20_spill]] }
0x1079   : > { %p35_p4 = scmp.ge.s32.totalorder %s38_s18, 6   ;;  %s4976_s26 = sld [smem:[#allocation21_spill]] }
0x107a   : > { %s4977_s27 = sld [smem:[#allocation32_spill]] }
0x107b   : > { %s4978_s28 = sld [smem:[#allocation23_spill]] }
0x107c   : > { %s4979_s29 = sld [smem:[#allocation24_spill]] }
0x107d   : > { %s4980_s30 = sld [smem:[#allocation33_spill]]  ;;  %37 = sbr.rel (!%p35_p4) target bundleno = 30 (0x1e), region = 207 }
0x107e   : > { %s4981_s14 = sld [smem:[#allocation27_spill]] }
0x107f   : > { %s4982_s15 = sld [smem:[#allocation28_spill]] }
0x1080   : > { %s4983_s16 = sld [smem:[#allocation30_spill]] }
0x1081   : > { %s4984_s17 = sld [smem:[#allocation31_spill]] }
0x1082   :  { %2781 = vsyncpa [#allocation4], 1 }
0x1083   :  { %2783 = vsyncpa [#allocation4 + $0x1], 1 }
0x1084   :  { %2784 = vsyncpa [#allocation7], 1 }
0x1085   :  { %2786 = vsyncpa [#allocation7 + $0x1], 1 }
0x1086   :  { %2787 = vsyncpa [#allocation10], 1 }
0x1087   :  { %2789 = vsyncpa [#allocation10 + $0x1], 1 }
0x1088   :  { %2790 = vsyncpa [#allocation13], 1 }
0x1089   :  { %2792 = vsyncpa [#allocation13 + $0x1], 1 }
0x108a   :  { %2793 = vsyncpa [#allocation5], 1 }
0x108b   :  { %2795 = vsyncpa [#allocation5 + $0x1], 1 }

</bundles_post_ra>
